<compile_context>
chip_gen: v6e
topology: v6e:2x2x1
jax: 0.10.0
libtpu: 0.0.40
codegen_flags: <defaults>
</compile_context>

<pallas_src>
import functools
import math

import jax
import jax.numpy as jnp
from jax import lax
from jax.experimental import pallas as pl
from jax.experimental.pallas import tpu as pltpu

GN_EPS = 1e-5        # torch.nn.GroupNorm default
LANE = 128
HALO = 8             # sublane-aligned halo rows; supports ceil(K/S) - 1 <= 8
MAX_TILE = 512       # target output-time rows per tile (f32)


def _round_up(x, m):
    return ((x + m - 1) // m) * m


def _gelu_exact(x):
    # HF ACT2FN["gelu"] == nn.GELU() (erf-based, exact)
    return 0.5 * x * (1.0 + lax.erf(x * (1.0 / math.sqrt(2.0))))


# ---------------------------------------------------------------------------
# Kernel bodies
# ---------------------------------------------------------------------------

def _conv_tile(x_ref, halo_ref, w_ref, q_taps):
    """Conv on one time tile.

    x_ref:    (TT, S*C_in)   stride-reshaped input rows for this tile
    halo_ref: (HALO, S*C_in) first rows of the next tile (overlap halo)
    w_ref:    (Q, S*C_in, C_out)
    Returns f32 (TT, C_out) = sum_q window[q:q+TT] @ w[q].
    """
    x = x_ref[...]
    tt = x.shape[0]
    acc = jnp.dot(x, w_ref[0], preferred_element_type=jnp.float32)
    if q_taps > 1:
        win = jnp.concatenate([x, halo_ref[...]], axis=0)      # (TT+HALO, SC)
        for q in range(1, q_taps):
            acc = acc + jnp.dot(win[q:q + tt], w_ref[q],
                                preferred_element_type=jnp.float32)
    return acc


def _conv_gelu_kernel(x_ref, halo_ref, w_ref, o_ref, *, q_taps):
    y = _conv_tile(x_ref, halo_ref, w_ref, q_taps)
    o_ref[...] = _gelu_exact(y).astype(o_ref.dtype)


def _conv_stats_kernel(x_ref, halo_ref, w_ref, stats_ref, *, q_taps, t_valid):
    # GroupNorm pass 1: per-channel sum / sum-of-squares over valid time rows.
    t = pl.program_id(1)
    y = _conv_tile(x_ref, halo_ref, w_ref, q_taps)              # (TT, C) f32
    tt, c = y.shape
    row = t * tt + lax.broadcasted_iota(jnp.int32, (tt, 1), 0)
    ym = jnp.where(row < t_valid, y, 0.0)
    s1 = jnp.sum(ym, axis=0, keepdims=True)                     # (1, C)
    s2 = jnp.sum(ym * ym, axis=0, keepdims=True)                # (1, C)
    upd = jnp.concatenate([s1, s2, jnp.zeros((HALO - 2, c), jnp.float32)],
                          axis=0)                               # (HALO, C)

    @pl.when(t == 0)
    def _():
        stats_ref[...] = upd

    @pl.when(t != 0)
    def _():
        stats_ref[...] = stats_ref[...] + upd


def _conv_gn_gelu_kernel(x_ref, halo_ref, w_ref, stats_ref, g_ref, b_ref,
                         o_ref, *, q_taps, t_valid):
    # GroupNorm pass 2: recompute conv, normalize with global stats, GELU.
    y = _conv_tile(x_ref, halo_ref, w_ref, q_taps)              # (TT, C) f32
    inv_n = jnp.float32(1.0 / t_valid)
    mean = stats_ref[0:1, :] * inv_n
    var = jnp.maximum(stats_ref[1:2, :] * inv_n - mean * mean, 0.0)
    yn = (y - mean) * lax.rsqrt(var + GN_EPS)
    yn = yn * g_ref[...] + b_ref[...]
    o_ref[...] = _gelu_exact(yn).astype(o_ref.dtype)


# ---------------------------------------------------------------------------
# Wrappers
# ---------------------------------------------------------------------------

def _vmem_limit(tt, sc, c, q):
    b = 4
    need = 2 * (tt * sc + HALO * sc + tt * c) * b + 2 * q * sc * c * b
    need = int(need * 1.5) + (8 << 20)
    return max(32 << 20, min(need, 48 << 20))   # stay within v7x's 64 MiB VMEM


def _conv_call(x, w_r, *, stride, tt, n_t, out_c, gn=None, t_valid=None):
    """One conv layer.  x: (B, P_in, C_in) with P_in >= (n_t*tt + HALO)*stride
    and P_in % stride == 0.  Returns (B, n_t*tt, out_c)."""
    batch, p_in, c_in = x.shape
    sc = stride * c_in
    q_taps = w_r.shape[0]
    x_r = x.reshape(batch, p_in // stride, sc)    # free bitcast reshape

    x_spec = pl.BlockSpec((None, tt, sc), lambda b, t: (b, t, 0))
    halo_spec = pl.BlockSpec((None, HALO, sc),
                             lambda b, t: (b, (t + 1) * (tt // HALO), 0))
    w_spec = pl.BlockSpec(w_r.shape, lambda b, t: (0, 0, 0))
    out_spec = pl.BlockSpec((None, tt, out_c), lambda b, t: (b, t, 0))
    vmem = _vmem_limit(tt, sc, out_c, q_taps)

    if gn is None:
        return pl.pallas_call(
            functools.partial(_conv_gelu_kernel, q_taps=q_taps),
            out_shape=jax.ShapeDtypeStruct((batch, n_t * tt, out_c), x.dtype),
            grid=(batch, n_t),
            in_specs=[x_spec, halo_spec, w_spec],
            out_specs=out_spec,
            compiler_params=pltpu.CompilerParams(
                dimension_semantics=("parallel", "parallel"),
                vmem_limit_bytes=vmem),
        )(x_r, x_r, w_r)

    gamma, beta = gn
    # Pass 1: per-(batch, channel) sum / sumsq over the valid time rows.
    stats = pl.pallas_call(
        functools.partial(_conv_stats_kernel, q_taps=q_taps, t_valid=t_valid),
        out_shape=jax.ShapeDtypeStruct((batch, HALO, out_c), jnp.float32),
        grid=(batch, n_t),
        in_specs=[x_spec, halo_spec, w_spec],
        out_specs=pl.BlockSpec((None, HALO, out_c), lambda b, t: (b, 0, 0)),
        compiler_params=pltpu.CompilerParams(
            dimension_semantics=("parallel", "arbitrary"),
            vmem_limit_bytes=vmem),
    )(x_r, x_r, w_r)
    # Pass 2: recompute the (cheap) conv, normalize, affine, GELU.
    stats_spec = pl.BlockSpec((None, HALO, out_c), lambda b, t: (b, 0, 0))
    vec_spec = pl.BlockSpec((1, out_c), lambda b, t: (0, 0))
    return pl.pallas_call(
        functools.partial(_conv_gn_gelu_kernel, q_taps=q_taps, t_valid=t_valid),
        out_shape=jax.ShapeDtypeStruct((batch, n_t * tt, out_c), x.dtype),
        grid=(batch, n_t),
        in_specs=[x_spec, halo_spec, w_spec, stats_spec, vec_spec, vec_spec],
        out_specs=out_spec,
        compiler_params=pltpu.CompilerParams(
            dimension_semantics=("parallel", "parallel"),
            vmem_limit_bytes=vmem),
    )(x_r, x_r, w_r, stats, gamma.reshape(1, out_c), beta.reshape(1, out_c))


def _plan(t_audio, kernels, strides, max_tile):
    """Backward tile planning: logical lengths, time tiles, physical (padded)
    row counts per layer and required padded input rows per layer."""
    n = len(kernels)
    t_log = [t_audio]
    for k, s in zip(kernels, strides):
        t_log.append((t_log[-1] - k) // s + 1)

    tts, n_ts, phys, reqs = [0] * n, [0] * n, [0] * n, [0] * n
    need_next = 0
    for i in reversed(range(n)):
        q = -(-kernels[i] // strides[i])
        assert q - 1 <= HALO, "conv kernel too wide for HALO rows"
        s_next = strides[i + 1] if i + 1 < n else 1
        m = 8 * s_next // math.gcd(8, s_next)          # lcm(8, next stride)
        need = max(t_log[i + 1], need_next)
        n_t = -(-need // max_tile)
        tt = _round_up(-(-need // n_t), m)
        tts[i], n_ts[i] = tt, n_t
        phys[i] = n_t * tt
        reqs[i] = (phys[i] + HALO) * strides[i]
        need_next = reqs[i]
    return t_log, tts, n_ts, phys, reqs


def _prep_conv_weight(w_oik, stride, c_in_phys, c_out_pad):
    """torch Conv1d weight (C_out, C_in, K) -> (Q, stride*c_in_phys, c_out_pad)
    matching the stride-reshaped input layout (zero-padded taps/channels)."""
    c_out, c_in, k = w_oik.shape
    q = -(-k // stride)
    wt = jnp.transpose(w_oik, (2, 1, 0)).astype(jnp.float32)     # (K, Cin, Cout)
    wt = jnp.pad(wt, ((0, q * stride - k),
                      (0, c_in_phys - c_in),
                      (0, c_out_pad - c_out)))
    return wt.reshape(q, stride * c_in_phys, c_out_pad)


def wav2vec2_feature_extractor(audio, params, conv_kernels, conv_strides,
                               max_tile=MAX_TILE):
    """audio: (B, T) raw waveform -> (B, C_out, T_out), matching PyTorch NCW."""
    batch, t_audio = audio.shape
    n_layers = len(conv_kernels)
    conv_dims = [params[f"conv{i}_w"].shape[0] for i in range(n_layers)]
    c_pads = [_round_up(c, LANE) for c in conv_dims]

    t_log, tts, n_ts, _, reqs = _plan(t_audio, conv_kernels, conv_strides,
                                      max_tile)

    # Lane-padded, stride-reshaped weights (tiny, traced once).
    w_rs = []
    for i in range(n_layers):
        c_in_phys = 1 if i == 0 else c_pads[i - 1]
        w_rs.append(_prep_conv_weight(params[f"conv{i}_w"], conv_strides[i],
                                      c_in_phys, c_pads[i]))
    gamma = jnp.pad(params["gn_gamma"].astype(jnp.float32),
                    (0, c_pads[0] - conv_dims[0]))
    beta = jnp.pad(params["gn_beta"].astype(jnp.float32),
                   (0, c_pads[0] - conv_dims[0]))

    # Zero-pad the raw audio once; all downstream tile/halo padding rows derive
    # from it and never touch valid outputs.
    target_rows = max(reqs[0], _round_up(t_audio, conv_strides[0]))
    x = jnp.pad(audio.astype(jnp.float32),
                ((0, 0), (0, target_rows - t_audio)))[..., None]   # (B, T', 1)

    for i in range(n_layers):
        gn = (gamma, beta) if i == 0 else None
        x = _conv_call(x, w_rs[i], stride=conv_strides[i], tt=tts[i],
                       n_t=n_ts[i], out_c=c_pads[i], gn=gn,
                       t_valid=t_log[1] if i == 0 else None)

    # Trim time/channel padding, return PyTorch NCW (B, C, T_out).
    out = x[:, :t_log[-1], :conv_dims[-1]]
    return jnp.transpose(out, (0, 2, 1))


# ---------------------------------------------------------------------------
# Pure-JAX reference (for correctness check)
# ---------------------------------------------------------------------------

def _reference(audio, params, kernels, strides):
    x = audio[:, None, :].astype(jnp.float32)        # (B, 1, T) NCW
    for i, (k, s) in enumerate(zip(kernels, strides)):
        w = params[f"conv{i}_w"].astype(jnp.float32)
        x = lax.conv_general_dilated(
            x, w, (s,), "VALID",
            dimension_numbers=("NCH", "OIH", "NCH"),
            precision=lax.Precision.HIGHEST)
        if i == 0:
            mean = jnp.mean(x, axis=2, keepdims=True)
            var = jnp.var(x, axis=2, keepdims=True)
            x = (x - mean) / jnp.sqrt(var + GN_EPS)
            x = x * params["gn_gamma"][None, :, None] + \
                params["gn_beta"][None, :, None]
        x = 0.5 * x * (1.0 + lax.erf(x * (1.0 / math.sqrt(2.0))))
    return x


if __name__ == "__main__":
    # Small synthetic config, same structure as the Wav2Vec2 feature encoder.
    B, T = 2, 400
    conv_dim = (32, 32, 32)
    conv_kernel = (10, 3, 2)
    conv_stride = (5, 2, 2)

    key = jax.random.PRNGKey(0)
    params = {}
    c_in = 1
    for i, (c_out, k) in enumerate(zip(conv_dim, conv_kernel)):
        key, sub = jax.random.split(key)
        # torch Conv1d weight layout: (C_out, C_in, K); no bias.
        w = jax.random.normal(sub, (c_out, c_in, k), jnp.float32)
        params[f"conv{i}_w"] = w * (1.0 / math.sqrt(c_in * k))
        c_in = c_out
    key, g_key, b_key = jax.random.split(key, 3)
    params["gn_gamma"] = 1.0 + 0.1 * jax.random.normal(
        g_key, (conv_dim[0],), jnp.float32)
    params["gn_beta"] = 0.1 * jax.random.normal(
        b_key, (conv_dim[0],), jnp.float32)

    key, x_key = jax.random.split(key)
    audio = jax.random.normal(x_key, (B, T), jnp.float32)

    fe = jax.jit(wav2vec2_feature_extractor, static_argnums=(2, 3))
    out = fe(audio, params, conv_kernel, conv_stride)
    jax.block_until_ready(out)

    t_out = T
    for k, s in zip(conv_kernel, conv_stride):
        t_out = (t_out - k) // s + 1
    assert out.shape == (B, conv_dim[-1], t_out), out.shape

    ref = _reference(audio, params, conv_kernel, conv_stride)
    max_err = float(jnp.max(jnp.abs(out - ref)))
    assert jnp.allclose(out, ref, atol=2e-3, rtol=2e-3), max_err

    print("KERNEL_OK")
</pallas_src>

<mosaic_0001>
module attributes {stable_mosaic.version = 11 : i64} {
  func.func @_conv_stats_kernel(%arg0: i32, %arg1: i32, %arg2: memref<1x144x5xf32, #tpu.memory_space<vmem>>, %arg3: memref<1x8x5xf32, #tpu.memory_space<vmem>>, %arg4: memref<2x5x128xf32, #tpu.memory_space<vmem>>, %arg5: memref<1x8x128xf32, #tpu.memory_space<vmem>>) attributes {dimension_semantics = [#tpu.dimension_semantics<parallel>, #tpu.dimension_semantics<arbitrary>], iteration_bounds = array<i64: 2, 1>, scalar_prefetch = 0 : i64, scratch_operands = 0 : i64, tpu.core_type = #tpu.core_type<tc>, window_params = [{transform_indices = @transform_0, window_bounds = array<i64: 1, 144, 5>}, {transform_indices = @transform_1, window_bounds = array<i64: 1, 8, 5>}, {pipeline_mode = #tpu.pipeline_mode<synchronous>, transform_indices = @transform_2, window_bounds = array<i64: 2, 5, 128>}, {transform_indices = @transform_3, window_bounds = array<i64: 1, 8, 128>}]} {
    %c0 = arith.constant 0 : index
    %c0_0 = arith.constant 0 : index
    %c0_1 = arith.constant 0 : index
    %0 = vector.load %arg2[%c0, %c0_0, %c0_1] : memref<1x144x5xf32, #tpu.memory_space<vmem>>, vector<1x144x5xf32>
    %1 = vector.shape_cast %0 : vector<1x144x5xf32> to vector<144x5xf32>
    %c0_2 = arith.constant 0 : index
    %c0_3 = arith.constant 0 : index
    %c0_4 = arith.constant 0 : index
    %2 = vector.load %arg4[%c0_2, %c0_3, %c0_4] : memref<2x5x128xf32, #tpu.memory_space<vmem>>, vector<1x5x128xf32>
    %3 = vector.shape_cast %2 : vector<1x5x128xf32> to vector<5x128xf32>
    %cst = arith.constant dense<0.000000e+00> : vector<144x128xf32>
    %4 = tpu.matmul %1, %3, %cst {dimension_numbers = #tpu.dot_dimension_numbers<[1], [0], [0], [1], [0, 0, 1, 1], [], []>} : vector<144x5xf32>, vector<5x128xf32>, vector<144x128xf32> -> vector<144x128xf32>
    %c0_5 = arith.constant 0 : index
    %c0_6 = arith.constant 0 : index
    %c0_7 = arith.constant 0 : index
    %5 = vector.load %arg3[%c0_5, %c0_6, %c0_7] : memref<1x8x5xf32, #tpu.memory_space<vmem>>, vector<1x8x5xf32>
    %6 = vector.shape_cast %5 : vector<1x8x5xf32> to vector<8x5xf32>
    %7 = tpu.concatenate %1, %6 in 0 : vector<144x5xf32>, vector<8x5xf32> -> vector<152x5xf32>
    %8 = vector.extract_strided_slice %7 {offsets = [1, 0], sizes = [144, 5], strides = [1, 1]} : vector<152x5xf32> to vector<144x5xf32>
    %c1 = arith.constant 1 : index
    %c0_8 = arith.constant 0 : index
    %c0_9 = arith.constant 0 : index
    %9 = vector.load %arg4[%c1, %c0_8, %c0_9] : memref<2x5x128xf32, #tpu.memory_space<vmem>>, vector<1x5x128xf32>
    %10 = vector.shape_cast %9 : vector<1x5x128xf32> to vector<5x128xf32>
    %cst_10 = arith.constant dense<0.000000e+00> : vector<144x128xf32>
    %11 = tpu.matmul %8, %10, %cst_10 {dimension_numbers = #tpu.dot_dimension_numbers<[1], [0], [0], [1], [0, 0, 1, 1], [], []>} : vector<144x5xf32>, vector<5x128xf32>, vector<144x128xf32> -> vector<144x128xf32>
    %12 = arith.addf %4, %11 : vector<144x128xf32>
    %c144_i32 = arith.constant 144 : i32
    %13 = arith.muli %arg1, %c144_i32 : i32
    %14 = tpu.iota {dimensions = array<i32: 0>} : vector<144x1xi32>
    %15 = vector.broadcast %13 : i32 to vector<144x1xi32>
    %16 = arith.addi %15, %14 : vector<144x1xi32>
    %c79_i32 = arith.constant 79 : i32
    %17 = vector.broadcast %c79_i32 : i32 to vector<144x1xi32>
    %18 = arith.cmpi slt, %16, %17 : vector<144x1xi32>
    %cst_11 = arith.constant 0.000000e+00 : f32
    %19 = vector.shape_cast %18 : vector<144x1xi1> to vector<144x1xi1>
    %20 = vector.broadcast %19 : vector<144x1xi1> to vector<144x128xi1>
    %21 = vector.broadcast %cst_11 : f32 to vector<144x128xf32>
    %22 = arith.select %20, %12, %21 : vector<144x128xi1>, vector<144x128xf32>
    %cst_12 = arith.constant dense<0.000000e+00> : vector<128xf32>
    %23 = vector.multi_reduction <add>, %22, %cst_12 [0] : vector<144x128xf32> to vector<128xf32>
    %24 = vector.shape_cast %23 : vector<128xf32> to vector<1x128xf32>
    %25 = arith.mulf %22, %22 : vector<144x128xf32>
    %cst_13 = arith.constant dense<0.000000e+00> : vector<128xf32>
    %26 = vector.multi_reduction <add>, %25, %cst_13 [0] : vector<144x128xf32> to vector<128xf32>
    %27 = vector.shape_cast %26 : vector<128xf32> to vector<1x128xf32>
    %cst_14 = arith.constant 0.000000e+00 : f32
    %28 = vector.broadcast %cst_14 : f32 to vector<6x128xf32>
    %29 = tpu.concatenate %24, %27, %28 in 0 : vector<1x128xf32>, vector<1x128xf32>, vector<6x128xf32> -> vector<8x128xf32>
    %c0_i32 = arith.constant 0 : i32
    %30 = arith.cmpi eq, %arg1, %c0_i32 : i32
    %31 = arith.extui %30 : i1 to i32
    %c0_i32_15 = arith.constant 0 : i32
    %32 = arith.cmpi ne, %31, %c0_i32_15 : i32
    scf.if %32 {
      %c0_18 = arith.constant 0 : index
      %c0_19 = arith.constant 0 : index
      %c0_20 = arith.constant 0 : index
      %36 = vector.load %arg5[%c0_18, %c0_19, %c0_20] : memref<1x8x128xf32, #tpu.memory_space<vmem>>, vector<1x8x128xf32>
      %37 = vector.shape_cast %36 : vector<1x8x128xf32> to vector<8x128xf32>
      %38 = vector.shape_cast %29 : vector<8x128xf32> to vector<1x8x128xf32>
      tpu.vector_store %arg5[%c0_18, %c0_19, %c0_20], %38 {strides = array<i32>} : memref<1x8x128xf32, #tpu.memory_space<vmem>>, vector<1x8x128xf32>,
    } else {
    }
    %c0_i32_16 = arith.constant 0 : i32
    %33 = arith.cmpi ne, %arg1, %c0_i32_16 : i32
    %34 = arith.extui %33 : i1 to i32
    %c0_i32_17 = arith.constant 0 : i32
    %35 = arith.cmpi ne, %34, %c0_i32_17 : i32
    scf.if %35 {
      %c0_18 = arith.constant 0 : index
      %c0_19 = arith.constant 0 : index
      %c0_20 = arith.constant 0 : index
      %36 = vector.load %arg5[%c0_18, %c0_19, %c0_20] : memref<1x8x128xf32, #tpu.memory_space<vmem>>, vector<1x8x128xf32>
      %37 = vector.shape_cast %36 : vector<1x8x128xf32> to vector<8x128xf32>
      %38 = arith.addf %37, %29 : vector<8x128xf32>
      %c0_21 = arith.constant 0 : index
      %c0_22 = arith.constant 0 : index
      %c0_23 = arith.constant 0 : index
      %39 = vector.load %arg5[%c0_21, %c0_22, %c0_23] : memref<1x8x128xf32, #tpu.memory_space<vmem>>, vector<1x8x128xf32>
      %40 = vector.shape_cast %39 : vector<1x8x128xf32> to vector<8x128xf32>
      %41 = vector.shape_cast %38 : vector<8x128xf32> to vector<1x8x128xf32>
      tpu.vector_store %arg5[%c0_21, %c0_22, %c0_23], %41 {strides = array<i32>} : memref<1x8x128xf32, #tpu.memory_space<vmem>>, vector<1x8x128xf32>,
    } else {
    }
    return
  }
  func.func @transform_0(%arg0: i32, %arg1: i32) -> (i32, i32, i32) {
    %c0_i32 = arith.constant 0 : i32
    %c0_i32_0 = arith.constant 0 : i32
    return %arg0, %arg1, %c0_i32 : i32, i32, i32
  }
  func.func @transform_1(%arg0: i32, %arg1: i32) -> (i32, i32, i32) {
    %c1_i32 = arith.constant 1 : i32
    %0 = arith.addi %arg1, %c1_i32 : i32
    %c18_i32 = arith.constant 18 : i32
    %1 = arith.muli %0, %c18_i32 : i32
    %c0_i32 = arith.constant 0 : i32
    %c0_i32_0 = arith.constant 0 : i32
    return %arg0, %1, %c0_i32 : i32, i32, i32
  }
  func.func @transform_2(%arg0: i32, %arg1: i32) -> (i32, i32, i32) {
    %c0_i32 = arith.constant 0 : i32
    %c0_i32_0 = arith.constant 0 : i32
    %c0_i32_1 = arith.constant 0 : i32
    %c0_i32_2 = arith.constant 0 : i32
    return %c0_i32, %c0_i32_0, %c0_i32_1 : i32, i32, i32
  }
  func.func @transform_3(%arg0: i32, %arg1: i32) -> (i32, i32, i32) {
    %c0_i32 = arith.constant 0 : i32
    %c0_i32_0 = arith.constant 0 : i32
    %c0_i32_1 = arith.constant 0 : i32
    return %arg0, %c0_i32, %c0_i32_0 : i32, i32, i32
  }
}

module attributes {stable_mosaic.version = 11 : i64} {
  func.func @_conv_gn_gelu_kernel(%arg0: i32, %arg1: i32, %arg2: memref<1x144x5xf32, #tpu.memory_space<vmem>>, %arg3: memref<1x8x5xf32, #tpu.memory_space<vmem>>, %arg4: memref<2x5x128xf32, #tpu.memory_space<vmem>>, %arg5: memref<1x8x128xf32, #tpu.memory_space<vmem>>, %arg6: memref<1x128xf32, #tpu.memory_space<vmem>>, %arg7: memref<1x128xf32, #tpu.memory_space<vmem>>, %arg8: memref<1x144x128xf32, #tpu.memory_space<vmem>>) attributes {dimension_semantics = [#tpu.dimension_semantics<parallel>, #tpu.dimension_semantics<parallel>], iteration_bounds = array<i64: 2, 1>, scalar_prefetch = 0 : i64, scratch_operands = 0 : i64, tpu.core_type = #tpu.core_type<tc>, window_params = [{transform_indices = @transform_0, window_bounds = array<i64: 1, 144, 5>}, {transform_indices = @transform_1, window_bounds = array<i64: 1, 8, 5>}, {pipeline_mode = #tpu.pipeline_mode<synchronous>, transform_indices = @transform_2, window_bounds = array<i64: 2, 5, 128>}, {transform_indices = @transform_3, window_bounds = array<i64: 1, 8, 128>}, {pipeline_mode = #tpu.pipeline_mode<synchronous>, transform_indices = @transform_4, window_bounds = array<i64: 1, 128>}, {pipeline_mode = #tpu.pipeline_mode<synchronous>, transform_indices = @transform_5, window_bounds = array<i64: 1, 128>}, {transform_indices = @transform_6, window_bounds = array<i64: 1, 144, 128>}]} {
    %c0 = arith.constant 0 : index
    %c0_0 = arith.constant 0 : index
    %c0_1 = arith.constant 0 : index
    %0 = vector.load %arg2[%c0, %c0_0, %c0_1] : memref<1x144x5xf32, #tpu.memory_space<vmem>>, vector<1x144x5xf32>
    %1 = vector.shape_cast %0 : vector<1x144x5xf32> to vector<144x5xf32>
    %c0_2 = arith.constant 0 : index
    %c0_3 = arith.constant 0 : index
    %c0_4 = arith.constant 0 : index
    %2 = vector.load %arg4[%c0_2, %c0_3, %c0_4] : memref<2x5x128xf32, #tpu.memory_space<vmem>>, vector<1x5x128xf32>
    %3 = vector.shape_cast %2 : vector<1x5x128xf32> to vector<5x128xf32>
    %cst = arith.constant dense<0.000000e+00> : vector<144x128xf32>
    %4 = tpu.matmul %1, %3, %cst {dimension_numbers = #tpu.dot_dimension_numbers<[1], [0], [0], [1], [0, 0, 1, 1], [], []>} : vector<144x5xf32>, vector<5x128xf32>, vector<144x128xf32> -> vector<144x128xf32>
    %c0_5 = arith.constant 0 : index
    %c0_6 = arith.constant 0 : index
    %c0_7 = arith.constant 0 : index
    %5 = vector.load %arg3[%c0_5, %c0_6, %c0_7] : memref<1x8x5xf32, #tpu.memory_space<vmem>>, vector<1x8x5xf32>
    %6 = vector.shape_cast %5 : vector<1x8x5xf32> to vector<8x5xf32>
    %7 = tpu.concatenate %1, %6 in 0 : vector<144x5xf32>, vector<8x5xf32> -> vector<152x5xf32>
    %8 = vector.extract_strided_slice %7 {offsets = [1, 0], sizes = [144, 5], strides = [1, 1]} : vector<152x5xf32> to vector<144x5xf32>
    %c1 = arith.constant 1 : index
    %c0_8 = arith.constant 0 : index
    %c0_9 = arith.constant 0 : index
    %9 = vector.load %arg4[%c1, %c0_8, %c0_9] : memref<2x5x128xf32, #tpu.memory_space<vmem>>, vector<1x5x128xf32>
    %10 = vector.shape_cast %9 : vector<1x5x128xf32> to vector<5x128xf32>
    %cst_10 = arith.constant dense<0.000000e+00> : vector<144x128xf32>
    %11 = tpu.matmul %8, %10, %cst_10 {dimension_numbers = #tpu.dot_dimension_numbers<[1], [0], [0], [1], [0, 0, 1, 1], [], []>} : vector<144x5xf32>, vector<5x128xf32>, vector<144x128xf32> -> vector<144x128xf32>
    %12 = arith.addf %4, %11 : vector<144x128xf32>
    %c0_11 = arith.constant 0 : index
    %c0_12 = arith.constant 0 : index
    %c0_13 = arith.constant 0 : index
    %13 = vector.load %arg5[%c0_11, %c0_12, %c0_13] : memref<1x8x128xf32, #tpu.memory_space<vmem>>, vector<1x1x128xf32>
    %14 = vector.shape_cast %13 : vector<1x1x128xf32> to vector<1x128xf32>
    %cst_14 = arith.constant 0.0126582282 : f32
    %15 = vector.broadcast %cst_14 : f32 to vector<1x128xf32>
    %16 = arith.mulf %14, %15 : vector<1x128xf32>
    %c0_15 = arith.constant 0 : index
    %c1_16 = arith.constant 1 : index
    %c0_17 = arith.constant 0 : index
    %17 = vector.load %arg5[%c0_15, %c1_16, %c0_17] : memref<1x8x128xf32, #tpu.memory_space<vmem>>, vector<1x1x128xf32>
    %18 = vector.shape_cast %17 : vector<1x1x128xf32> to vector<1x128xf32>
    %cst_18 = arith.constant 0.0126582282 : f32
    %19 = vector.broadcast %cst_18 : f32 to vector<1x128xf32>
    %20 = arith.mulf %18, %19 : vector<1x128xf32>
    %21 = arith.mulf %16, %16 : vector<1x128xf32>
    %22 = arith.subf %20, %21 : vector<1x128xf32>
    %cst_19 = arith.constant 0.000000e+00 : f32
    %23 = vector.broadcast %cst_19 : f32 to vector<1x128xf32>
    %24 = arith.maximumf %22, %23 : vector<1x128xf32>
    %25 = vector.broadcast %16 : vector<1x128xf32> to vector<144x128xf32>
    %26 = arith.subf %12, %25 : vector<144x128xf32>
    %cst_20 = arith.constant 9.99999974E-6 : f32
    %27 = vector.broadcast %cst_20 : f32 to vector<1x128xf32>
    %28 = arith.addf %24, %27 : vector<1x128xf32>
    %29 = math.rsqrt %28 : vector<1x128xf32>
    %30 = vector.broadcast %29 : vector<1x128xf32> to vector<144x128xf32>
    %31 = arith.mulf %26, %30 : vector<144x128xf32>
    %c0_21 = arith.constant 0 : index
    %c0_22 = arith.constant 0 : index
    %32 = vector.load %arg6[%c0_21, %c0_22] : memref<1x128xf32, #tpu.memory_space<vmem>>, vector<1x128xf32>
    %33 = vector.broadcast %32 : vector<1x128xf32> to vector<144x128xf32>
    %34 = arith.mulf %31, %33 : vector<144x128xf32>
    %c0_23 = arith.constant 0 : index
    %c0_24 = arith.constant 0 : index
    %35 = vector.load %arg7[%c0_23, %c0_24] : memref<1x128xf32, #tpu.memory_space<vmem>>, vector<1x128xf32>
    %36 = vector.broadcast %35 : vector<1x128xf32> to vector<144x128xf32>
    %37 = arith.addf %34, %36 : vector<144x128xf32>
    %cst_25 = arith.constant 5.000000e-01 : f32
    %38 = vector.broadcast %cst_25 : f32 to vector<144x128xf32>
    %39 = arith.mulf %38, %37 : vector<144x128xf32>
    %cst_26 = arith.constant 0.707106769 : f32
    %40 = vector.broadcast %cst_26 : f32 to vector<144x128xf32>
    %41 = arith.mulf %37, %40 : vector<144x128xf32>
    %42 = math.erf %41 : vector<144x128xf32>
    %cst_27 = arith.constant 1.000000e+00 : f32
    %43 = vector.broadcast %cst_27 : f32 to vector<144x128xf32>
    %44 = arith.addf %43, %42 : vector<144x128xf32>
    %45 = arith.mulf %39, %44 : vector<144x128xf32>
    %c0_28 = arith.constant 0 : index
    %c0_29 = arith.constant 0 : index
    %c0_30 = arith.constant 0 : index
    %46 = vector.load %arg8[%c0_28, %c0_29, %c0_30] : memref<1x144x128xf32, #tpu.memory_space<vmem>>, vector<1x144x128xf32>
    %47 = vector.shape_cast %46 : vector<1x144x128xf32> to vector<144x128xf32>
    %48 = vector.shape_cast %45 : vector<144x128xf32> to vector<1x144x128xf32>
    tpu.vector_store %arg8[%c0_28, %c0_29, %c0_30], %48 {strides = array<i32>} : memref<1x144x128xf32, #tpu.memory_space<vmem>>, vector<1x144x128xf32>,
    return
  }
  func.func @transform_0(%arg0: i32, %arg1: i32) -> (i32, i32, i32) {
    %c0_i32 = arith.constant 0 : i32
    %c0_i32_0 = arith.constant 0 : i32
    return %arg0, %arg1, %c0_i32 : i32, i32, i32
  }
  func.func @transform_1(%arg0: i32, %arg1: i32) -> (i32, i32, i32) {
    %c1_i32 = arith.constant 1 : i32
    %0 = arith.addi %arg1, %c1_i32 : i32
    %c18_i32 = arith.constant 18 : i32
    %1 = arith.muli %0, %c18_i32 : i32
    %c0_i32 = arith.constant 0 : i32
    %c0_i32_0 = arith.constant 0 : i32
    return %arg0, %1, %c0_i32 : i32, i32, i32
  }
  func.func @transform_2(%arg0: i32, %arg1: i32) -> (i32, i32, i32) {
    %c0_i32 = arith.constant 0 : i32
    %c0_i32_0 = arith.constant 0 : i32
    %c0_i32_1 = arith.constant 0 : i32
    %c0_i32_2 = arith.constant 0 : i32
    return %c0_i32, %c0_i32_0, %c0_i32_1 : i32, i32, i32
  }
  func.func @transform_3(%arg0: i32, %arg1: i32) -> (i32, i32, i32) {
    %c0_i32 = arith.constant 0 : i32
    %c0_i32_0 = arith.constant 0 : i32
    %c0_i32_1 = arith.constant 0 : i32
    return %arg0, %c0_i32, %c0_i32_0 : i32, i32, i32
  }
  func.func @transform_4(%arg0: i32, %arg1: i32) -> (i32, i32) {
    %c0_i32 = arith.constant 0 : i32
    %c0_i32_0 = arith.constant 0 : i32
    %c0_i32_1 = arith.constant 0 : i32
    return %c0_i32, %c0_i32_0 : i32, i32
  }
  func.func @transform_5(%arg0: i32, %arg1: i32) -> (i32, i32) {
    %c0_i32 = arith.constant 0 : i32
    %c0_i32_0 = arith.constant 0 : i32
    %c0_i32_1 = arith.constant 0 : i32
    return %c0_i32, %c0_i32_0 : i32, i32
  }
  func.func @transform_6(%arg0: i32, %arg1: i32) -> (i32, i32, i32) {
    %c0_i32 = arith.constant 0 : i32
    %c0_i32_0 = arith.constant 0 : i32
    return %arg0, %arg1, %c0_i32 : i32, i32, i32
  }
}

module attributes {stable_mosaic.version = 11 : i64} {
  func.func @_conv_gelu_kernel(%arg0: i32, %arg1: i32, %arg2: memref<1x64x256xf32, #tpu.memory_space<vmem>>, %arg3: memref<1x8x256xf32, #tpu.memory_space<vmem>>, %arg4: memref<2x256x128xf32, #tpu.memory_space<vmem>>, %arg5: memref<1x64x128xf32, #tpu.memory_space<vmem>>) attributes {dimension_semantics = [#tpu.dimension_semantics<parallel>, #tpu.dimension_semantics<parallel>], iteration_bounds = array<i64: 2, 1>, scalar_prefetch = 0 : i64, scratch_operands = 0 : i64, tpu.core_type = #tpu.core_type<tc>, window_params = [{transform_indices = @transform_0, window_bounds = array<i64: 1, 64, 256>}, {transform_indices = @transform_1, window_bounds = array<i64: 1, 8, 256>}, {pipeline_mode = #tpu.pipeline_mode<synchronous>, transform_indices = @transform_2, window_bounds = array<i64: 2, 256, 128>}, {transform_indices = @transform_3, window_bounds = array<i64: 1, 64, 128>}]} {
    %c0 = arith.constant 0 : index
    %c0_0 = arith.constant 0 : index
    %c0_1 = arith.constant 0 : index
    %0 = vector.load %arg2[%c0, %c0_0, %c0_1] : memref<1x64x256xf32, #tpu.memory_space<vmem>>, vector<1x64x256xf32>
    %1 = vector.shape_cast %0 : vector<1x64x256xf32> to vector<64x256xf32>
    %c0_2 = arith.constant 0 : index
    %c0_3 = arith.constant 0 : index
    %c0_4 = arith.constant 0 : index
    %2 = vector.load %arg4[%c0_2, %c0_3, %c0_4] : memref<2x256x128xf32, #tpu.memory_space<vmem>>, vector<1x256x128xf32>
    %3 = vector.shape_cast %2 : vector<1x256x128xf32> to vector<256x128xf32>
    %cst = arith.constant dense<0.000000e+00> : vector<64x128xf32>
    %4 = tpu.matmul %1, %3, %cst {dimension_numbers = #tpu.dot_dimension_numbers<[1], [0], [0], [1], [0, 0, 1, 1], [], []>} : vector<64x256xf32>, vector<256x128xf32>, vector<64x128xf32> -> vector<64x128xf32>
    %c0_5 = arith.constant 0 : index
    %c0_6 = arith.constant 0 : index
    %c0_7 = arith.constant 0 : index
    %5 = vector.load %arg3[%c0_5, %c0_6, %c0_7] : memref<1x8x256xf32, #tpu.memory_space<vmem>>, vector<1x8x256xf32>
    %6 = vector.shape_cast %5 : vector<1x8x256xf32> to vector<8x256xf32>
    %7 = tpu.concatenate %1, %6 in 0 : vector<64x256xf32>, vector<8x256xf32> -> vector<72x256xf32>
    %8 = vector.extract_strided_slice %7 {offsets = [1, 0], sizes = [64, 256], strides = [1, 1]} : vector<72x256xf32> to vector<64x256xf32>
    %c1 = arith.constant 1 : index
    %c0_8 = arith.constant 0 : index
    %c0_9 = arith.constant 0 : index
    %9 = vector.load %arg4[%c1, %c0_8, %c0_9] : memref<2x256x128xf32, #tpu.memory_space<vmem>>, vector<1x256x128xf32>
    %10 = vector.shape_cast %9 : vector<1x256x128xf32> to vector<256x128xf32>
    %cst_10 = arith.constant dense<0.000000e+00> : vector<64x128xf32>
    %11 = tpu.matmul %8, %10, %cst_10 {dimension_numbers = #tpu.dot_dimension_numbers<[1], [0], [0], [1], [0, 0, 1, 1], [], []>} : vector<64x256xf32>, vector<256x128xf32>, vector<64x128xf32> -> vector<64x128xf32>
    %12 = arith.addf %4, %11 : vector<64x128xf32>
    %cst_11 = arith.constant 5.000000e-01 : f32
    %13 = vector.broadcast %cst_11 : f32 to vector<64x128xf32>
    %14 = arith.mulf %13, %12 : vector<64x128xf32>
    %cst_12 = arith.constant 0.707106769 : f32
    %15 = vector.broadcast %cst_12 : f32 to vector<64x128xf32>
    %16 = arith.mulf %12, %15 : vector<64x128xf32>
    %17 = math.erf %16 : vector<64x128xf32>
    %cst_13 = arith.constant 1.000000e+00 : f32
    %18 = vector.broadcast %cst_13 : f32 to vector<64x128xf32>
    %19 = arith.addf %18, %17 : vector<64x128xf32>
    %20 = arith.mulf %14, %19 : vector<64x128xf32>
    %c0_14 = arith.constant 0 : index
    %c0_15 = arith.constant 0 : index
    %c0_16 = arith.constant 0 : index
    %21 = vector.load %arg5[%c0_14, %c0_15, %c0_16] : memref<1x64x128xf32, #tpu.memory_space<vmem>>, vector<1x64x128xf32>
    %22 = vector.shape_cast %21 : vector<1x64x128xf32> to vector<64x128xf32>
    %23 = vector.shape_cast %20 : vector<64x128xf32> to vector<1x64x128xf32>
    tpu.vector_store %arg5[%c0_14, %c0_15, %c0_16], %23 {strides = array<i32>} : memref<1x64x128xf32, #tpu.memory_space<vmem>>, vector<1x64x128xf32>,
    return
  }
  func.func @transform_0(%arg0: i32, %arg1: i32) -> (i32, i32, i32) {
    %c0_i32 = arith.constant 0 : i32
    %c0_i32_0 = arith.constant 0 : i32
    return %arg0, %arg1, %c0_i32 : i32, i32, i32
  }
  func.func @transform_1(%arg0: i32, %arg1: i32) -> (i32, i32, i32) {
    %c1_i32 = arith.constant 1 : i32
    %0 = arith.addi %arg1, %c1_i32 : i32
    %c8_i32 = arith.constant 8 : i32
    %1 = arith.muli %0, %c8_i32 : i32
    %c0_i32 = arith.constant 0 : i32
    %c0_i32_0 = arith.constant 0 : i32
    return %arg0, %1, %c0_i32 : i32, i32, i32
  }
  func.func @transform_2(%arg0: i32, %arg1: i32) -> (i32, i32, i32) {
    %c0_i32 = arith.constant 0 : i32
    %c0_i32_0 = arith.constant 0 : i32
    %c0_i32_1 = arith.constant 0 : i32
    %c0_i32_2 = arith.constant 0 : i32
    return %c0_i32, %c0_i32_0, %c0_i32_1 : i32, i32, i32
  }
  func.func @transform_3(%arg0: i32, %arg1: i32) -> (i32, i32, i32) {
    %c0_i32 = arith.constant 0 : i32
    %c0_i32_0 = arith.constant 0 : i32
    return %arg0, %arg1, %c0_i32 : i32, i32, i32
  }
}

module attributes {stable_mosaic.version = 11 : i64} {
  func.func @_conv_gelu_kernel(%arg0: i32, %arg1: i32, %arg2: memref<1x24x256xf32, #tpu.memory_space<vmem>>, %arg3: memref<1x8x256xf32, #tpu.memory_space<vmem>>, %arg4: memref<1x256x128xf32, #tpu.memory_space<vmem>>, %arg5: memref<1x24x128xf32, #tpu.memory_space<vmem>>) attributes {dimension_semantics = [#tpu.dimension_semantics<parallel>, #tpu.dimension_semantics<parallel>], iteration_bounds = array<i64: 2, 1>, scalar_prefetch = 0 : i64, scratch_operands = 0 : i64, tpu.core_type = #tpu.core_type<tc>, window_params = [{transform_indices = @transform_0, window_bounds = array<i64: 1, 24, 256>}, {transform_indices = @transform_1, window_bounds = array<i64: 1, 8, 256>}, {pipeline_mode = #tpu.pipeline_mode<synchronous>, transform_indices = @transform_2, window_bounds = array<i64: 1, 256, 128>}, {transform_indices = @transform_3, window_bounds = array<i64: 1, 24, 128>}]} {
    %c0 = arith.constant 0 : index
    %c0_0 = arith.constant 0 : index
    %c0_1 = arith.constant 0 : index
    %0 = vector.load %arg2[%c0, %c0_0, %c0_1] : memref<1x24x256xf32, #tpu.memory_space<vmem>>, vector<1x24x256xf32>
    %1 = vector.shape_cast %0 : vector<1x24x256xf32> to vector<24x256xf32>
    %c0_2 = arith.constant 0 : index
    %c0_3 = arith.constant 0 : index
    %c0_4 = arith.constant 0 : index
    %2 = vector.load %arg4[%c0_2, %c0_3, %c0_4] : memref<1x256x128xf32, #tpu.memory_space<vmem>>, vector<1x256x128xf32>
    %3 = vector.shape_cast %2 : vector<1x256x128xf32> to vector<256x128xf32>
    %cst = arith.constant dense<0.000000e+00> : vector<24x128xf32>
    %4 = tpu.matmul %1, %3, %cst {dimension_numbers = #tpu.dot_dimension_numbers<[1], [0], [0], [1], [0, 0, 1, 1], [], []>} : vector<24x256xf32>, vector<256x128xf32>, vector<24x128xf32> -> vector<24x128xf32>
    %cst_5 = arith.constant 5.000000e-01 : f32
    %5 = vector.broadcast %cst_5 : f32 to vector<24x128xf32>
    %6 = arith.mulf %5, %4 : vector<24x128xf32>
    %cst_6 = arith.constant 0.707106769 : f32
    %7 = vector.broadcast %cst_6 : f32 to vector<24x128xf32>
    %8 = arith.mulf %4, %7 : vector<24x128xf32>
    %9 = math.erf %8 : vector<24x128xf32>
    %cst_7 = arith.constant 1.000000e+00 : f32
    %10 = vector.broadcast %cst_7 : f32 to vector<24x128xf32>
    %11 = arith.addf %10, %9 : vector<24x128xf32>
    %12 = arith.mulf %6, %11 : vector<24x128xf32>
    %c0_8 = arith.constant 0 : index
    %c0_9 = arith.constant 0 : index
    %c0_10 = arith.constant 0 : index
    %13 = vector.load %arg5[%c0_8, %c0_9, %c0_10] : memref<1x24x128xf32, #tpu.memory_space<vmem>>, vector<1x24x128xf32>
    %14 = vector.shape_cast %13 : vector<1x24x128xf32> to vector<24x128xf32>
    %15 = vector.shape_cast %12 : vector<24x128xf32> to vector<1x24x128xf32>
    tpu.vector_store %arg5[%c0_8, %c0_9, %c0_10], %15 {strides = array<i32>} : memref<1x24x128xf32, #tpu.memory_space<vmem>>, vector<1x24x128xf32>,
    return
  }
  func.func @transform_0(%arg0: i32, %arg1: i32) -> (i32, i32, i32) {
    %c0_i32 = arith.constant 0 : i32
    %c0_i32_0 = arith.constant 0 : i32
    return %arg0, %arg1, %c0_i32 : i32, i32, i32
  }
  func.func @transform_1(%arg0: i32, %arg1: i32) -> (i32, i32, i32) {
    %c1_i32 = arith.constant 1 : i32
    %0 = arith.addi %arg1, %c1_i32 : i32
    %c3_i32 = arith.constant 3 : i32
    %1 = arith.muli %0, %c3_i32 : i32
    %c0_i32 = arith.constant 0 : i32
    %c0_i32_0 = arith.constant 0 : i32
    return %arg0, %1, %c0_i32 : i32, i32, i32
  }
  func.func @transform_2(%arg0: i32, %arg1: i32) -> (i32, i32, i32) {
    %c0_i32 = arith.constant 0 : i32
    %c0_i32_0 = arith.constant 0 : i32
    %c0_i32_1 = arith.constant 0 : i32
    %c0_i32_2 = arith.constant 0 : i32
    return %c0_i32, %c0_i32_0, %c0_i32_1 : i32, i32, i32
  }
  func.func @transform_3(%arg0: i32, %arg1: i32) -> (i32, i32, i32) {
    %c0_i32 = arith.constant 0 : i32
    %c0_i32_0 = arith.constant 0 : i32
    return %arg0, %arg1, %c0_i32 : i32, i32, i32
  }
}

</mosaic_0001>

<bundles_post_ra>
// kernel: wav2vec2_feature_extractor.5
= control target key start
LH: loop header
LB: loop body
LE: loop exit
PB: predicated region body
PF: predicated region fallthrough
CT: control target
= control target key end

     0   :  { %s1445_s21 = smov 0   ;;  %s1447_s22 = smov 0   ;;  %s1735_s0 = inlined_call_operand.vmem [shape: f32[2,152,5], index: 0, kind: input, shape index: {}, may-alias: {0,1}]   ;;  %s1736_s1 = inlined_call_operand.vmem [shape: f32[2,152,5], index: 1, kind: input, shape index: {}, may-alias: {0,1}]   ;;  %s1737_s2 = inlined_call_operand.vmem [shape: f32[2,5,128], index: 2, kind: input, shape index: {}]   ;;  %s1738_s3 = inlined_call_operand.vmem [shape: f32[2,8,128], index: 3, kind: input, shape index: {}]   ;;  %s1739_s4 = inlined_call_operand.vmem [shape: f32[1,128], index: 4, kind: input, shape index: {}]   ;;  %s1740_s5 = inlined_call_operand.vmem [shape: f32[1,128], index: 5, kind: input, shape index: {}]   ;;  %s1741_s6 = inlined_call_operand.vmem [shape: f32[2,144,128], index: 6, kind: output, shape index: {}]  }
   0x1   :  { %s1449_s23 = smov 0  }
   0x2 LB: > { %s28_s24 = sadd.s32 1, %s1404_s22  ;;  %p1174_p0 = scmp.ge.s32.totalorder %s1408_s23, 1  ;;  %s1408_s23 = sphi %s1449_s23, %s16_s23   ;;  %s1404_s22 = sphi %s1447_s22, %s1743_s22   ;;  %s1400_s21 = sphi %s1445_s21, %s1742_s21  }
   0x3   : > { %p30_p1 = scmp.ge.s32.totalorder %s28_s24, 2  ;;  %p273_p2 = scmp.lt.s32.totalorder %s1408_s23, 3 }
   0x5   : > { %s1745_s24 = smov (%p30_p1, %s28_s24), 0  ;;  %p274_p3 = pnand %p1174_p0, %p273_p2 }
   0x6   : > { %p334_p4 = scmp.lt.s32.totalorder (!%p274_p3), %s1400_s21, 1 }
   0x7   : > { %277 = sbr.rel (%p274_p3) target bundleno = 283 (0x11b), region = 44 }
   0xc   : > { %v391_v0 = vld [vmem:[%s1737_s2] sm:$0x1f]  ;;  %vm489_vm0 = vcmask 1044480   ;;  %v1179_v1 = vld [vmem:[%s1737_s2 + $0x8] sm:$0x1f]  ;;  %s1747_s21 = smov (!%p334_p4, %s1400_s21), 1 }
   0xd   : > { %1291 = vmatprep.subr.msk.mxu1 %vm489_vm0, %v391_v0  ;;  %1262 = vmatprep.subr.msk.mxu0 %vm489_vm0, %v1179_v1  ;;  %s1320_s29 = smul.u32 152, %s1747_s21  ;;  %vm452_vm1 = vcmask 39936   ;;  %vm414_vm2 = vcmask 1046528   ;;  %s1177_s13 = sshll.u32 %s1747_s21, 3 }
   0xe   : > { %1292 = vmatpush3.msk.msra.mxu1 %vm489_vm0, %v391_v0  ;;  %1263 = vmatpush3.msk.msra.mxu0 %vm489_vm0, %v1179_v1  ;;  %s362_s16 = scalar_lea.vmem %s1738_s3, %s1177_s13  ;;  %s1322_s25 = smul.u32 144, %s1747_s21 }
   0xf   : > { %s1477_s8 = scalar_lea.vmem %s1735_s0, %s1320_s29  ;;  %s1223_s9 = sadd.s32 144, %s1320_s29  ;;  %v842_v58 = vld [vmem:[%s362_s16] sm:$0x1]  ;;  %v844_v60 = vld [vmem:[%s362_s16 + $0x1] sm:$0x1] }
  0x10   : > { %v373_v2 = vld [vmem:[%s1477_s8] sm:$0xff]  ;;  %v374_v3 = vld [vmem:[%s1477_s8 + $0x8] sm:$0xff]  ;;  %v375_v6 = vld [vmem:[%s1477_s8 + $0x10] sm:$0xff]  ;;  %s356_s12 = scalar_lea.vmem %s1736_s1, %s1223_s9  ;;  %v843_v59 = vmul.f32 0.012658228, %v842_v58  ;;  %s1648_s27 = scalar_lea.vmem %s1741_s6, %s1322_s25 }
  0x11   : > { %v415_v4 = vrot.slane %v373_v2, 1  ;;  %1293 = vmatprep.mubr.msk.f32.mxu1 %vm452_vm1, %v373_v2  ;;  %v416_v5 = vrot.slane %v374_v3, 1  ;;  %v376_v7 = vld [vmem:[%s1477_s8 + $0x18] sm:$0xff]  ;;  %v377_v8 = vld [vmem:[%s1477_s8 + $0x20] sm:$0xff]  ;;  %v418_v9 = vrot.slane %v375_v6, 1  ;;  %v378_v11 = vld [vmem:[%s1477_s8 + $0x28] sm:$0xff]  ;;  %v849_v2 = vlaneseq }
  0x12   : > { %1294 = vmatmul.mubr.msk.f32.vlgmr.msra.gmra.mxu1 %vm452_vm1, %v374_v3  ;;  %v420_v10 = vrot.slane %v376_v7, 1  ;;  %v422_v13 = vrot.slane %v377_v8, 1  ;;  %v424_v14 = vrot.slane %v378_v11, 1  ;;  %v379_v15 = vld [vmem:[%s1477_s8 + $0x30] sm:$0xff]  ;;  %v380_v18 = vld [vmem:[%s1477_s8 + $0x38] sm:$0xff]  ;;  %v381_v23 = vld [vmem:[%s1477_s8 + $0x40] sm:$0xff]  ;;  %v846_v62 = vmul.f32 %v843_v59, %v843_v59 }
  0x13   : > { %v417_v12 = vsel %vm414_vm2, %v415_v4, %v416_v5  ;;  %1296 = vmatprep.mubr.msk.f32.mxu1 %vm452_vm1, %v375_v6  ;;  %v419_v16 = vsel %vm414_vm2, %v416_v5, %v418_v9  ;;  %v426_v20 = vrot.slane %v379_v15, 1  ;;  %v428_v22 = vrot.slane %v380_v18, 1  ;;  %v382_v24 = vld [vmem:[%s1477_s8 + $0x48] sm:$0xff]  ;;  %v383_v29 = vld [vmem:[%s1477_s8 + $0x50] sm:$0xff]  ;;  %v384_v30 = vld [vmem:[%s1477_s8 + $0x58] sm:$0xff] }
  0x14   : > { %1264 = vmatprep.mubr.msk.f32.mxu0 %vm452_vm1, %v417_v12  ;;  %v421_v17 = vsel %vm414_vm2, %v418_v9, %v420_v10  ;;  %v423_v19 = vsel %vm414_vm2, %v420_v10, %v422_v13  ;;  %v425_v21 = vsel %vm414_vm2, %v422_v13, %v424_v14  ;;  %v430_v26 = vrot.slane %v381_v23, 1  ;;  %v385_v35 = vld [vmem:[%s1477_s8 + $0x60] sm:$0xff]  ;;  %v386_v36 = vld [vmem:[%s1477_s8 + $0x68] sm:$0xff]  ;;  %v387_v41 = vld [vmem:[%s1477_s8 + $0x70] sm:$0xff] }
  0x15   : > { %1265 = vmatmul.mubr.msk.f32.vlgmr.msra.gmra.mxu0 %vm452_vm1, %v419_v16  ;;  %v427_v25 = vsel %vm414_vm2, %v424_v14, %v426_v20  ;;  %v429_v27 = vsel %vm414_vm2, %v426_v20, %v428_v22  ;;  %v432_v28 = vrot.slane %v382_v24, 1  ;;  %v434_v32 = vrot.slane %v383_v29, 1  ;;  %v388_v42 = vld [vmem:[%s1477_s8 + $0x78] sm:$0xff]  ;;  %v389_v47 = vld [vmem:[%s1477_s8 + $0x80] sm:$0xff]  ;;  %v390_v48 = vld [vmem:[%s1477_s8 + $0x88] sm:$0xff] }
  0x16   : > { %1297 = vmatmul.mubr.msk.f32.gmra.mxu1 %vm452_vm1, %v376_v7  ;;  %1267 = vmatprep.mubr.msk.f32.mxu0 %vm452_vm1, %v421_v17  ;;  %v431_v31 = vsel %vm414_vm2, %v428_v22, %v430_v26  ;;  %v436_v34 = vrot.slane %v384_v30, 1  ;;  %v438_v38 = vrot.slane %v385_v35, 1  ;;  %v440_v40 = vrot.slane %v386_v36, 1  ;;  %v392_v53 = vld [vmem:[%s356_s12] sm:$0xff] }
  0x17   : > { %1299 = vmatprep.mubr.msk.f32.mxu1 %vm452_vm1, %v377_v8  ;;  %v433_v33 = vsel %vm414_vm2, %v430_v26, %v432_v28  ;;  %v435_v37 = vsel %vm414_vm2, %v432_v28, %v434_v32  ;;  %v442_v44 = vrot.slane %v387_v41, 1  ;;  %v444_v46 = vrot.slane %v388_v42, 1  ;;  %v1568_v17 = vld [vmem:[%s1739_s4] ss:$0 sm:$0xff] }
  0x18   : > { %v437_v39 = vsel %vm414_vm2, %v434_v32, %v436_v34  ;;  %v439_v43 = vsel %vm414_vm2, %v436_v34, %v438_v38  ;;  %v441_v45 = vsel %vm414_vm2, %v438_v38, %v440_v40  ;;  %v446_v50 = vrot.slane %v389_v47, 1 }
  0x19   : > { %1268 = vmatmul.mubr.msk.f32.gmra.mxu0 %vm452_vm1, %v423_v19  ;;  %v443_v49 = vsel %vm414_vm2, %v440_v40, %v442_v44  ;;  %v445_v51 = vsel %vm414_vm2, %v442_v44, %v444_v46  ;;  %v448_v52 = vrot.slane %v390_v48, 1  ;;  %v450_v55 = vrot.slane %v392_v53, 1 }
  0x1a   : > { %1300 = vmatmul.mubr.msk.f32.gmra.mxu1 %vm452_vm1, %v378_v11  ;;  %1270 = vmatprep.mubr.msk.f32.mxu0 %vm452_vm1, %v425_v21  ;;  %v447_v54 = vsel %vm414_vm2, %v444_v46, %v446_v50  ;;  %v845_v61 = vmul.f32 0.012658228, %v844_v60  ;;  %v850_v3 = vshrl.u32 %v849_v2, 7 }
  0x1b   : > { %1302 = vmatprep.mubr.msk.f32.mxu1 %vm452_vm1, %v379_v15  ;;  %v449_v56 = vsel %vm414_vm2, %v446_v50, %v448_v52  ;;  %v451_v57 = vsel %vm414_vm2, %v448_v52, %v450_v55 }
  0x1c   : > { %v847_v63 = vsub.f32 %v845_v61, %v846_v62  ;;  %v851_v4 = vsub.s32 0, %v850_v3 }
  0x1d   : > { %1271 = vmatmul.mubr.msk.f32.gmra.mxu0 %vm452_vm1, %v427_v25 }
  0x1e   : > { %1303 = vmatmul.mubr.msk.f32.gmra.mxu1 %vm452_vm1, %v380_v18  ;;  %1273 = vmatprep.mubr.msk.f32.mxu0 %vm452_vm1, %v429_v27  ;;  %v848_v0 = vmax.f32 %v847_v63, 0.0  ;;  %v1560_v7 = vrot.slane %v843_v59, %v851_v4 }
  0x1f   : > { %1305 = vmatprep.mubr.msk.f32.mxu1 %vm452_vm1, %v381_v23  ;;  %v1575_v23 = vld [vmem:[%s1740_s5] ss:$0 sm:$0xff] }
  0x20   : > { %v871_v1 = vadd.f32 1e-05, %v848_v0 }
  0x21   : > { %1274 = vmatmul.mubr.msk.f32.gmra.mxu0 %vm452_vm1, %v431_v31 }
  0x22   : > { %1306 = vmatmul.mubr.msk.f32.gmra.mxu1 %vm452_vm1, %v382_v24  ;;  %1276 = vmatprep.mubr.msk.f32.mxu0 %vm452_vm1, %v433_v33  ;;  %1348 = vrsqrt.f32 %v871_v1 }
  0x23   : > { %1308 = vmatprep.mubr.msk.f32.mxu1 %vm452_vm1, %v383_v29 }
  0x25   : > { %1277 = vmatmul.mubr.msk.f32.gmra.mxu0 %vm452_vm1, %v435_v37 }
  0x26   : > { %1309 = vmatmul.mubr.msk.f32.gmra.mxu1 %vm452_vm1, %v384_v30  ;;  %1279 = vmatprep.mubr.msk.f32.mxu0 %vm452_vm1, %v437_v39 }
  0x27   : > { %1311 = vmatprep.mubr.msk.f32.mxu1 %vm452_vm1, %v385_v35 }
  0x29   : > { %1280 = vmatmul.mubr.msk.f32.gmra.mxu0 %vm452_vm1, %v439_v43 }
  0x2a   : > { %1312 = vmatmul.mubr.msk.f32.gmra.mxu1 %vm452_vm1, %v386_v36  ;;  %1282 = vmatprep.mubr.msk.f32.mxu0 %vm452_vm1, %v441_v45 }
  0x2b   : > { %1314 = vmatprep.mubr.msk.f32.mxu1 %vm452_vm1, %v387_v41 }
  0x2d   : > { %1283 = vmatmul.mubr.msk.f32.gmra.mxu0 %vm452_vm1, %v443_v49 }
  0x2e   : > { %1315 = vmatmul.mubr.msk.f32.gmra.mxu1 %vm452_vm1, %v388_v42  ;;  %1285 = vmatprep.mubr.msk.f32.mxu0 %vm452_vm1, %v445_v51 }
  0x2f   : > { %1317 = vmatprep.mubr.msk.f32.mxu1 %vm452_vm1, %v389_v47  ;;  %v1349_v6 = vpop.eup %1348 }
  0x30   : > { %v1562_v10 = vrot.slane %v1349_v6, %v851_v4 }
  0x31   : > { %1286 = vmatmul.mubr.msk.f32.gmra.mxu0 %vm452_vm1, %v447_v54 }
  0x32   : > { %1318 = vmatmul.mubr.msk.f32.gmra.mxu1 %vm452_vm1, %v390_v48  ;;  %1288 = vmatprep.mubr.msk.f32.mxu0 %vm452_vm1, %v449_v56 }
  0x35   : > { %1289 = vmatmul.mubr.msk.f32.gmra.mxu0 %vm452_vm1, %v451_v57 }
  0xd2   : > { %v1295_v5 = vpop.f32.mrf.mxu1 }
  0xd4   : > { %v753_v8 = vpop.f32.mrf.mxu1 }
  0xd5   : > { %v1266_v9 = vpop.f32.mrf.mxu0 }
  0xd6   : > { %v759_v11 = vadd.f32 %v1295_v5, %v1266_v9  ;;  %v1298_v12 = vpop.f32.mrf.mxu1 }
  0xd7   : > { %v559_v13 = vpop.f32.mrf.mxu0 }
  0xd8   : > { %v854_v14 = vsub.f32 %v759_v11, %v1560_v7  ;;  %v754_v15 = vadd.f32 %v753_v8, %v559_v13  ;;  %v763_v16 = vpop.f32.mrf.mxu1 }
  0xd9   : > { %v1269_v18 = vpop.f32.mrf.mxu0 }
  0xda   : > { %v878_v19 = vmul.f32 %v1562_v10, %v854_v14  ;;  %v853_v20 = vsub.f32 %v754_v15, %v1560_v7  ;;  %v769_v21 = vadd.f32 %v1298_v12, %v1269_v18  ;;  %v1301_v22 = vpop.f32.mrf.mxu1 }
  0xdb   : > { %v569_v24 = vpop.f32.mrf.mxu0 }
  0xdc   : > { %v903_v25 = vmul.f32 %v1568_v17, %v878_v19  ;;  %v877_v26 = vmul.f32 %v1562_v10, %v853_v20  ;;  %v856_v27 = vsub.f32 %v769_v21, %v1560_v7  ;;  %v764_v28 = vadd.f32 %v763_v16, %v569_v24  ;;  %v773_v29 = vpop.f32.mrf.mxu1 }
  0xdd   : > { %v1272_v30 = vpop.f32.mrf.mxu0 }
  0xde   : > { %v1581_v31 = vadd.f32 %v1575_v23, %v903_v25  ;;  %v902_v32 = vmul.f32 %v1568_v17, %v877_v26  ;;  %v880_v33 = vmul.f32 %v1562_v10, %v856_v27  ;;  %v855_v34 = vsub.f32 %v764_v28, %v1560_v7  ;;  %v1304_v35 = vpop.f32.mrf.mxu1 }
  0xdf   : > { %v779_v36 = vadd.f32 %v1301_v22, %v1272_v30  ;;  %v579_v37 = vpop.f32.mrf.mxu0 }
  0xe0   : > { %v964_v38 = vmul.f32 0.70710677, %v1581_v31  ;;  %v1588_v39 = vadd.f32 %v1575_v23, %v902_v32  ;;  %v905_v40 = vmul.f32 %v1568_v17, %v880_v33  ;;  %v783_v41 = vpop.f32.mrf.mxu1  ;;  %v879_v42 = vmul.f32 %v1562_v10, %v855_v34 }
  0xe1   : > { %v858_v43 = vsub.f32 %v779_v36, %v1560_v7  ;;  %v774_v44 = vadd.f32 %v773_v29, %v579_v37  ;;  %v1275_v45 = vpop.f32.mrf.mxu0  ;;  %v946_v34 = vmul.f32 0.5, %v1581_v31 }
  0xe2   : > { %1350 = verf.f32 %v964_v38  ;;  %v963_v46 = vmul.f32 0.70710677, %v1588_v39  ;;  %v1595_v47 = vadd.f32 %v1575_v23, %v905_v40  ;;  %v1307_v48 = vpop.f32.mrf.mxu1  ;;  %v904_v49 = vmul.f32 %v1568_v17, %v879_v42 }
  0xe3   : > { %v882_v50 = vmul.f32 %v1562_v10, %v858_v43  ;;  %v857_v51 = vsub.f32 %v774_v44, %v1560_v7  ;;  %v789_v52 = vadd.f32 %v1304_v35, %v1275_v45  ;;  %v589_v53 = vpop.f32.mrf.mxu0  ;;  %v945_v45 = vmul.f32 0.5, %v1588_v39 }
  0xe4   : > { %1352 = verf.f32 %v963_v46  ;;  %v966_v54 = vmul.f32 0.70710677, %v1595_v47  ;;  %v784_v55 = vadd.f32 %v783_v41, %v589_v53  ;;  %v793_v56 = vpop.f32.mrf.mxu1  ;;  %v1602_v57 = vadd.f32 %v1575_v23, %v904_v49 }
  0xe5   : > { %v907_v58 = vmul.f32 %v1568_v17, %v882_v50  ;;  %v881_v59 = vmul.f32 %v1562_v10, %v857_v51  ;;  %v860_v60 = vsub.f32 %v789_v52, %v1560_v7  ;;  %v1278_v61 = vpop.f32.mrf.mxu0 }
  0xe6   : > { %1354 = verf.f32 %v966_v54  ;;  %v859_v62 = vsub.f32 %v784_v55, %v1560_v7  ;;  %v799_v63 = vadd.f32 %v1307_v48, %v1278_v61  ;;  %v1310_v0 = vpop.f32.mrf.mxu1  ;;  %v965_v1 = vmul.f32 0.70710677, %v1602_v57 }
  0xe7   : > { %v1610_v2 = vadd.f32 %v1575_v23, %v907_v58  ;;  %v906_v3 = vmul.f32 %v1568_v17, %v881_v59  ;;  %v599_v4 = vpop.f32.mrf.mxu0  ;;  %v884_v5 = vmul.f32 %v1562_v10, %v860_v60  ;;  %v948_v58 = vmul.f32 0.5, %v1595_v47 }
  0xe8   : > { %v883_v6 = vmul.f32 %v1562_v10, %v859_v62  ;;  %v862_v8 = vsub.f32 %v799_v63, %v1560_v7  ;;  %v794_v9 = vadd.f32 %v793_v56, %v599_v4  ;;  %v803_v11 = vpop.f32.mrf.mxu1  ;;  %1356 = verf.f32 %v965_v1 }
  0xe9   : > { %v968_v12 = vmul.f32 0.70710677, %v1610_v2  ;;  %v1618_v13 = vadd.f32 %v1575_v23, %v906_v3  ;;  %v1281_v14 = vpop.f32.mrf.mxu0  ;;  %v909_v15 = vmul.f32 %v1568_v17, %v884_v5 }
  0xea   : > { %v908_v16 = vmul.f32 %v1568_v17, %v883_v6  ;;  %v886_v18 = vmul.f32 %v1562_v10, %v862_v8  ;;  %v861_v19 = vsub.f32 %v794_v9, %v1560_v7  ;;  %v1313_v20 = vpop.f32.mrf.mxu1  ;;  %v809_v22 = vadd.f32 %v1310_v0, %v1281_v14 }
  0xeb   : > { %1358 = verf.f32 %v968_v12  ;;  %v967_v21 = vmul.f32 0.70710677, %v1618_v13  ;;  %v609_v24 = vpop.f32.mrf.mxu0  ;;  %v1626_v25 = vadd.f32 %v1575_v23, %v909_v15  ;;  %v947_v9 = vmul.f32 0.5, %v1602_v57 }
  0xec   : > { %v1629_v26 = vadd.f32 %v1575_v23, %v908_v16  ;;  %v911_v27 = vmul.f32 %v1568_v17, %v886_v18  ;;  %v885_v28 = vmul.f32 %v1562_v10, %v861_v19  ;;  %v813_v29 = vpop.f32.mrf.mxu1  ;;  %v864_v30 = vsub.f32 %v809_v22, %v1560_v7 }
  0xed   : > { %1360 = verf.f32 %v967_v21  ;;  %v804_v32 = vadd.f32 %v803_v11, %v609_v24  ;;  %v1284_v33 = vpop.f32.mrf.mxu0  ;;  %v970_v35 = vmul.f32 0.70710677, %v1626_v25  ;;  %v950_v21 = vmul.f32 0.5, %v1610_v2 }
  0xee   : > { %v969_v36 = vmul.f32 0.70710677, %v1629_v26  ;;  %v1639_v38 = vadd.f32 %v1575_v23, %v911_v27  ;;  %v910_v40 = vmul.f32 %v1568_v17, %v885_v28  ;;  %v888_v41 = vmul.f32 %v1562_v10, %v864_v30  ;;  %v1316_v46 = vpop.f32.mrf.mxu1 }
  0xef   : > { %v1351_v37 = vpop.eup %1350  ;;  %v863_v42 = vsub.f32 %v804_v32, %v1560_v7  ;;  %v619_v43 = vpop.f32.mrf.mxu0  ;;  %1362 = verf.f32 %v970_v35  ;;  %v819_v31 = vadd.f32 %v1313_v20, %v1284_v33 }
  0xf0   : > { %v1000_v44 = vadd.f32 1.0, %v1351_v37  ;;  %1364 = verf.f32 %v969_v36  ;;  %v972_v49 = vmul.f32 0.70710677, %v1639_v38  ;;  %v1652_v50 = vadd.f32 %v1575_v23, %v910_v40  ;;  %v823_v3 = vpop.f32.mrf.mxu1 }
  0xf1   : > { %v1353_v48 = vpop.eup %1352  ;;  %v814_v51 = vadd.f32 %v813_v29, %v619_v43  ;;  %v1287_v52 = vpop.f32.mrf.mxu0  ;;  %v913_v54 = vmul.f32 %v1568_v17, %v888_v41  ;;  %v887_v55 = vmul.f32 %v1562_v10, %v863_v42  ;;  %v866_v60 = vsub.f32 %v819_v31, %v1560_v7 }
  0xf2   : > { %v1018_v53 = vmul.f32 %v1000_v44, %v946_v34  ;;  %v999_v39 = vadd.f32 1.0, %v1353_v48  ;;  %1366 = verf.f32 %v972_v49  ;;  %v971_v59 = vmul.f32 0.70710677, %v1652_v50  ;;  %v1319_v24 = vpop.f32.mrf.mxu1 }
  0xf3   : > { %v1355_v56 = vpop.eup %1354  ;;  %v629_v61 = vpop.f32.mrf.mxu0  ;;  %v1661_v0 = vadd.f32 %v1575_v23, %v913_v54  ;;  %v912_v1 = vmul.f32 %v1568_v17, %v887_v55  ;;  %v890_v47 = vmul.f32 %v1562_v10, %v866_v60  ;;  %v865_v4 = vsub.f32 %v814_v51, %v1560_v7 }
  0xf4   : > { %1036 = vst [vmem:[%s1648_s27 + $0x8] sm:$0xff] %v1018_v53  ;;  %v1017_v62 = vmul.f32 %v999_v39, %v945_v45  ;;  %v1002_v63 = vadd.f32 1.0, %v1355_v56  ;;  %1368 = verf.f32 %v971_v59  ;;  %v829_v5 = vadd.f32 %v1316_v46, %v1287_v52  ;;  %v833_v31 = vpop.f32.mrf.mxu1 }
  0xf5   : > { %v1357_v6 = vpop.eup %1356  ;;  %v974_v11 = vmul.f32 0.70710677, %v1661_v0  ;;  %v1670_v12 = vadd.f32 %v1575_v23, %v912_v1  ;;  %v1290_v14 = vpop.f32.mrf.mxu0  ;;  %v915_v16 = vmul.f32 %v1568_v17, %v890_v47  ;;  %v889_v18 = vmul.f32 %v1562_v10, %v865_v4 }
  0xf6   : > { %1035 = vst [vmem:[%s1648_s27] sm:$0xff] %v1017_v62  ;;  %v1020_v8 = vmul.f32 %v1002_v63, %v948_v58  ;;  %v1001_v15 = vadd.f32 1.0, %v1357_v6  ;;  %v868_v19 = vsub.f32 %v829_v5, %v1560_v7  ;;  %v824_v22 = vadd.f32 %v823_v3, %v629_v61 }
  0xf7   : > { %1370 = verf.f32 %v974_v11  ;;  %v973_v57 = vmul.f32 0.70710677, %v1670_v12  ;;  %v1679_v29 = vadd.f32 %v1575_v23, %v915_v16  ;;  %v914_v30 = vmul.f32 %v1568_v17, %v889_v18  ;;  %v639_v35 = vpop.f32.mrf.mxu0 }
  0xf8   : > { %v1359_v20 = vpop.eup %1358  ;;  %1038 = vst [vmem:[%s1648_s27 + $0x18] sm:$0xff] %v1020_v8  ;;  %v1019_v27 = vmul.f32 %v1001_v15, %v947_v9  ;;  %v892_v33 = vmul.f32 %v1562_v10, %v868_v19  ;;  %v867_v34 = vsub.f32 %v824_v22, %v1560_v7  ;;  %v839_v2 = vadd.f32 %v1319_v24, %v1290_v14 }
  0xf9   : > { %v1004_v28 = vadd.f32 1.0, %v1359_v20  ;;  %1372 = verf.f32 %v973_v57  ;;  %v949_v37 = vmul.f32 0.5, %v1618_v13  ;;  %v976_v41 = vmul.f32 0.70710677, %v1679_v29 }
  0xfa   : > { %v1361_v32 = vpop.eup %1360  ;;  %1037 = vst [vmem:[%s1648_s27 + $0x10] sm:$0xff] %v1019_v27  ;;  %v1688_v42 = vadd.f32 %v1575_v23, %v914_v30  ;;  %v917_v43 = vmul.f32 %v1568_v17, %v892_v33  ;;  %v891_v44 = vmul.f32 %v1562_v10, %v867_v34  ;;  %v870_v45 = vsub.f32 %v839_v2, %v1560_v7 }
  0xfb   : > { %v1022_v36 = vmul.f32 %v1004_v28, %v950_v21  ;;  %v1003_v40 = vadd.f32 1.0, %v1361_v32  ;;  %v952_v49 = vmul.f32 0.5, %v1626_v25  ;;  %1374 = verf.f32 %v976_v41 }
  0xfc   : > { %v1363_v46 = vpop.eup %1362  ;;  %v834_v13 = vadd.f32 %v833_v31, %v639_v35  ;;  %v951_v53 = vmul.f32 0.5, %v1629_v26  ;;  %v975_v39 = vmul.f32 0.70710677, %v1688_v42  ;;  %v942_v54 = vadd.f32 %v1575_v23, %v917_v43 }
  0xfd   : > { %1040 = vst [vmem:[%s1648_s27 + $0x28] sm:$0xff] %v1022_v36  ;;  %v1021_v48 = vmul.f32 %v1003_v40, %v949_v37  ;;  %v1365_v51 = vpop.eup %1364  ;;  %v1006_v52 = vadd.f32 1.0, %v1363_v46  ;;  %v916_v56 = vmul.f32 %v1568_v17, %v891_v44  ;;  %v894_v58 = vmul.f32 %v1562_v10, %v870_v45 }
  0xfe   : > { %v1005_v55 = vadd.f32 1.0, %v1365_v51  ;;  %v869_v25 = vsub.f32 %v834_v13, %v1560_v7  ;;  %v954_v61 = vmul.f32 0.5, %v1639_v38  ;;  %1376 = verf.f32 %v975_v39 }
  0xff   : > { %1039 = vst [vmem:[%s1648_s27 + $0x20] sm:$0xff] %v1021_v48  ;;  %v1367_v59 = vpop.eup %1366  ;;  %v1024_v60 = vmul.f32 %v1006_v52, %v952_v49  ;;  %v978_v26 = vmul.f32 0.70710677, %v942_v54  ;;  %v941_v1 = vadd.f32 %v1575_v23, %v916_v56  ;;  %v919_v3 = vmul.f32 %v1568_v17, %v894_v58 }
 0x100   : > { %v1023_v62 = vmul.f32 %v1005_v55, %v951_v53  ;;  %v1008_v63 = vadd.f32 1.0, %v1367_v59  ;;  %v893_v4 = vmul.f32 %v1562_v10, %v869_v25  ;;  %v953_v5 = vmul.f32 0.5, %v1652_v50 }
 0x101   : > { %v1369_v47 = vpop.eup %1368  ;;  %1042 = vst [vmem:[%s1648_s27 + $0x38] sm:$0xff] %v1024_v60  ;;  %1378 = verf.f32 %v978_v26  ;;  %v977_v6 = vmul.f32 0.70710677, %v941_v1  ;;  %v944_v8 = vadd.f32 %v1575_v23, %v919_v3  ;;  %v956_v15 = vmul.f32 0.5, %v1661_v0 }
 0x102   : > { %1041 = vst [vmem:[%s1648_s27 + $0x30] sm:$0xff] %v1023_v62  ;;  %v1026_v7 = vmul.f32 %v1008_v63, %v954_v61  ;;  %v1007_v38 = vadd.f32 1.0, %v1369_v47  ;;  %v918_v9 = vmul.f32 %v1568_v17, %v893_v4  ;;  %v955_v20 = vmul.f32 0.5, %v1670_v12 }
 0x103   : > { %1380 = verf.f32 %v977_v6  ;;  %v980_v10 = vmul.f32 0.70710677, %v944_v8  ;;  %v958_v0 = vmul.f32 0.5, %v1679_v29  ;;  %v957_v28 = vmul.f32 0.5, %v1688_v42 }
 0x104   : > { %v1371_v11 = vpop.eup %1370  ;;  %1044 = vst [vmem:[%s1648_s27 + $0x48] sm:$0xff] %v1026_v7  ;;  %v1025_v14 = vmul.f32 %v1007_v38, %v953_v5  ;;  %v943_v18 = vadd.f32 %v1575_v23, %v918_v9  ;;  %v960_v33 = vmul.f32 0.5, %v942_v54  ;;  %v959_v35 = vmul.f32 0.5, %v941_v1 }
 0x105   : > { %v1010_v16 = vadd.f32 1.0, %v1371_v11  ;;  %1382 = verf.f32 %v980_v10  ;;  %v962_v41 = vmul.f32 0.5, %v944_v8 }
 0x106   : > { %v1373_v19 = vpop.eup %1372  ;;  %1043 = vst [vmem:[%s1648_s27 + $0x40] sm:$0xff] %v1025_v14  ;;  %v979_v17 = vmul.f32 0.70710677, %v943_v18  ;;  %v961_v45 = vmul.f32 0.5, %v943_v18 }
 0x107   : > { %v1028_v50 = vmul.f32 %v1010_v16, %v956_v15  ;;  %v1009_v21 = vadd.f32 1.0, %v1373_v19 }
 0x108   : > { %v1375_v57 = vpop.eup %1374  ;;  %1384 = verf.f32 %v979_v17 }
 0x109   : > { %1046 = vst [vmem:[%s1648_s27 + $0x58] sm:$0xff] %v1028_v50  ;;  %v1027_v22 = vmul.f32 %v1009_v21, %v955_v20  ;;  %v1012_v24 = vadd.f32 1.0, %v1375_v57 }
 0x10b   : > { %1045 = vst [vmem:[%s1648_s27 + $0x50] sm:$0xff] %v1027_v22  ;;  %v1377_v23 = vpop.eup %1376  ;;  %v1030_v27 = vmul.f32 %v1012_v24, %v958_v0 }
 0x10c   : > { %v1011_v30 = vadd.f32 1.0, %v1377_v23 }
 0x10d   : > { %1048 = vst [vmem:[%s1648_s27 + $0x68] sm:$0xff] %v1030_v27 }
 0x10e   : > { %v1379_v12 = vpop.eup %1378  ;;  %v1029_v32 = vmul.f32 %v1011_v30, %v957_v28 }
 0x10f   : > { %v1014_v34 = vadd.f32 1.0, %v1379_v12 }
 0x110   : > { %v1381_v2 = vpop.eup %1380  ;;  %1047 = vst [vmem:[%s1648_s27 + $0x60] sm:$0xff] %v1029_v32 }
 0x111   : > { %v1032_v29 = vmul.f32 %v1014_v34, %v960_v33  ;;  %v1013_v36 = vadd.f32 1.0, %v1381_v2 }
 0x112   : > { %v1383_v37 = vpop.eup %1382 }
 0x113   : > { %1050 = vst [vmem:[%s1648_s27 + $0x78] sm:$0xff] %v1032_v29  ;;  %v1031_v40 = vmul.f32 %v1013_v36, %v959_v35  ;;  %v1016_v43 = vadd.f32 1.0, %v1383_v37 }
 0x115   : > { %1049 = vst [vmem:[%s1648_s27 + $0x70] sm:$0xff] %v1031_v40  ;;  %v1385_v42 = vpop.eup %1384  ;;  %v1034_v44 = vmul.f32 %v1016_v43, %v962_v41 }
 0x116   : > { %v1015_v31 = vadd.f32 1.0, %v1385_v42 }
 0x117   : > { %1052 = vst [vmem:[%s1648_s27 + $0x88] sm:$0xff] %v1034_v44 }
 0x118   : > { %v1033_v46 = vmul.f32 %v1015_v31, %v961_v45 }
 0x11a   : > { %1051 = vst [vmem:[%s1648_s27 + $0x80] sm:$0xff] %v1033_v46 }
 0x11b PF: > { %s16_s23 = sadd.s32 1, %s1408_s23   ;;  %s1742_s21 = smov %s1404_s22 }
 0x11c   : > { %p13_p5 = scmp.ge.s32.totalorder %s16_s23, 4   ;;  %s1743_s22 = smov %s1745_s24 }
 0x11e   :  { %15 = sbr.rel (!%p13_p5) target bundleno = 2 (0x2), region = 81 }

// kernel: wav2vec2_feature_extractor.4
= control target key start
LH: loop header
LB: loop body
LE: loop exit
PB: predicated region body
PF: predicated region fallthrough
CT: control target
= control target key end

     0   :  { %s1225_s12 = smov 0   ;;  %s1227_s13 = smov 0   ;;  %s1349_s0 = inlined_call_operand.vmem [shape: f32[2,152,5], index: 0, kind: input, shape index: {}, may-alias: {0,1}]   ;;  %s1350_s1 = inlined_call_operand.vmem [shape: f32[2,152,5], index: 1, kind: input, shape index: {}, may-alias: {0,1}]   ;;  %s1351_s2 = inlined_call_operand.vmem [shape: f32[2,5,128], index: 2, kind: input, shape index: {}]   ;;  %s1352_s3 = inlined_call_operand.vmem [shape: f32[2,8,128], index: 3, kind: output, shape index: {}]  }
   0x1   :  { %s1229_s14 = smov 0  }
   0x2 LB: > { %s25_s15 = sadd.s32 1, %s1199_s13  ;;  %p1011_p0 = scmp.ge.s32.totalorder %s1203_s14, 1  ;;  %s1203_s14 = sphi %s1229_s14, %s13_s14   ;;  %s1199_s13 = sphi %s1227_s13, %s1354_s13   ;;  %s1195_s12 = sphi %s1225_s12, %s1353_s12  }
   0x3   : > { %p27_p1 = scmp.ge.s32.totalorder %s25_s15, 2  ;;  %p187_p2 = scmp.lt.s32.totalorder %s1203_s14, 3 }
   0x5   : > { %s1356_s15 = smov (%p27_p1, %s25_s15), 0  ;;  %p188_p3 = pnand %p1011_p0, %p187_p2 }
   0x6   : > { %p233_p4 = scmp.lt.s32.totalorder (!%p188_p3), %s1195_s12, 1 }
   0x7   : > { %191 = sbr.rel (%p188_p3) target bundleno = 255 (0xff), region = 32 }
   0xc   : > { %v280_v0 = vld [vmem:[%s1351_s2] sm:$0x1f]  ;;  %vm378_vm0 = vcmask 1044480   ;;  %v1015_v1 = vld [vmem:[%s1351_s2 + $0x8] sm:$0x1f]  ;;  %s1358_s12 = smov (!%p233_p4, %s1195_s12), 1 }
   0xd   : > { %1125 = vmatprep.subr.msk.mxu1 %vm378_vm0, %v280_v0  ;;  %1096 = vmatprep.subr.msk.mxu0 %vm378_vm0, %v1015_v1  ;;  %s1154_s20 = smul.u32 152, %s1358_s12  ;;  %vm341_vm1 = vcmask 39936   ;;  %vm303_vm2 = vcmask 1046528   ;;  %s1014_s28 = sshll.u32 %s1358_s12, 3  ;;  %vm906_vm4 = vcmask 1040384   ;;  %vm908_vm5 = vcmask 1041408  }
   0xe   : > { %1126 = vmatpush3.msk.msra.mxu1 %vm378_vm0, %v280_v0  ;;  %1097 = vmatpush3.msk.msra.mxu0 %vm378_vm0, %v1015_v1  ;;  %s261_s4 = scalar_lea.vmem %s1352_s3, %s1014_s28 }
   0xf   : > { %s1257_s23 = scalar_lea.vmem %s1349_s0, %s1154_s20  ;;  %s1057_s24 = sadd.s32 144, %s1154_s20 }
  0x10   : > { %v262_v2 = vld [vmem:[%s1257_s23] sm:$0xff]  ;;  %v263_v3 = vld [vmem:[%s1257_s23 + $0x8] sm:$0xff]  ;;  %v264_v4 = vld [vmem:[%s1257_s23 + $0x10] sm:$0xff]  ;;  %s255_s27 = scalar_lea.vmem %s1350_s1, %s1057_s24 }
  0x11   : > { %v304_v5 = vrot.slane %v262_v2, 1  ;;  %1127 = vmatprep.mubr.msk.f32.mxu1 %vm341_vm1, %v262_v2  ;;  %v305_v6 = vrot.slane %v263_v3, 1  ;;  %v307_v7 = vrot.slane %v264_v4, 1  ;;  %v265_v8 = vld [vmem:[%s1257_s23 + $0x18] sm:$0xff]  ;;  %v266_v9 = vld [vmem:[%s1257_s23 + $0x20] sm:$0xff]  ;;  %v267_v10 = vld [vmem:[%s1257_s23 + $0x28] sm:$0xff] }
  0x12   : > { %1128 = vmatmul.mubr.msk.f32.vlgmr.msra.gmra.mxu1 %vm341_vm1, %v263_v3  ;;  %v309_v11 = vrot.slane %v265_v8, 1  ;;  %v311_v12 = vrot.slane %v266_v9, 1  ;;  %v313_v15 = vrot.slane %v267_v10, 1  ;;  %v268_v16 = vld [vmem:[%s1257_s23 + $0x30] sm:$0xff]  ;;  %v269_v18 = vld [vmem:[%s1257_s23 + $0x38] sm:$0xff]  ;;  %v270_v23 = vld [vmem:[%s1257_s23 + $0x40] sm:$0xff]  ;;  %v732_v3 = vlaneseq }
  0x13   : > { %v306_v13 = vsel %vm303_vm2, %v304_v5, %v305_v6  ;;  %v308_v14 = vsel %vm303_vm2, %v305_v6, %v307_v7  ;;  %1130 = vmatprep.mubr.msk.f32.mxu1 %vm341_vm1, %v264_v4  ;;  %v315_v20 = vrot.slane %v268_v16, 1  ;;  %v317_v22 = vrot.slane %v269_v18, 1  ;;  %v271_v24 = vld [vmem:[%s1257_s23 + $0x48] sm:$0xff]  ;;  %v272_v29 = vld [vmem:[%s1257_s23 + $0x50] sm:$0xff]  ;;  %v273_v30 = vld [vmem:[%s1257_s23 + $0x58] sm:$0xff] }
  0x14   : > { %1098 = vmatprep.mubr.msk.f32.mxu0 %vm341_vm1, %v306_v13  ;;  %v310_v17 = vsel %vm303_vm2, %v307_v7, %v309_v11  ;;  %v312_v19 = vsel %vm303_vm2, %v309_v11, %v311_v12  ;;  %v314_v21 = vsel %vm303_vm2, %v311_v12, %v313_v15  ;;  %v319_v26 = vrot.slane %v270_v23, 1  ;;  %v274_v35 = vld [vmem:[%s1257_s23 + $0x60] sm:$0xff]  ;;  %v275_v36 = vld [vmem:[%s1257_s23 + $0x68] sm:$0xff]  ;;  %v276_v41 = vld [vmem:[%s1257_s23 + $0x70] sm:$0xff] }
  0x15   : > { %1099 = vmatmul.mubr.msk.f32.vlgmr.msra.gmra.mxu0 %vm341_vm1, %v308_v14  ;;  %v316_v25 = vsel %vm303_vm2, %v313_v15, %v315_v20  ;;  %v318_v27 = vsel %vm303_vm2, %v315_v20, %v317_v22  ;;  %v321_v28 = vrot.slane %v271_v24, 1  ;;  %v323_v32 = vrot.slane %v272_v29, 1  ;;  %v277_v42 = vld [vmem:[%s1257_s23 + $0x78] sm:$0xff]  ;;  %v278_v47 = vld [vmem:[%s1257_s23 + $0x80] sm:$0xff]  ;;  %v279_v48 = vld [vmem:[%s1257_s23 + $0x88] sm:$0xff] }
  0x16   : > { %1131 = vmatmul.mubr.msk.f32.gmra.mxu1 %vm341_vm1, %v265_v8  ;;  %1101 = vmatprep.mubr.msk.f32.mxu0 %vm341_vm1, %v310_v17  ;;  %v320_v31 = vsel %vm303_vm2, %v317_v22, %v319_v26  ;;  %v325_v34 = vrot.slane %v273_v30, 1  ;;  %v327_v38 = vrot.slane %v274_v35, 1  ;;  %v329_v40 = vrot.slane %v275_v36, 1  ;;  %v281_v53 = vld [vmem:[%s255_s27] sm:$0xff] }
  0x17   : > { %1133 = vmatprep.mubr.msk.f32.mxu1 %vm341_vm1, %v266_v9  ;;  %v322_v33 = vsel %vm303_vm2, %v319_v26, %v321_v28  ;;  %v324_v37 = vsel %vm303_vm2, %v321_v28, %v323_v32  ;;  %v331_v44 = vrot.slane %v276_v41, 1  ;;  %v333_v46 = vrot.slane %v277_v42, 1 }
  0x18   : > { %v326_v39 = vsel %vm303_vm2, %v323_v32, %v325_v34  ;;  %v328_v43 = vsel %vm303_vm2, %v325_v34, %v327_v38  ;;  %v330_v45 = vsel %vm303_vm2, %v327_v38, %v329_v40  ;;  %v335_v50 = vrot.slane %v278_v47, 1 }
  0x19   : > { %1102 = vmatmul.mubr.msk.f32.gmra.mxu0 %vm341_vm1, %v312_v19  ;;  %v332_v49 = vsel %vm303_vm2, %v329_v40, %v331_v44  ;;  %v334_v51 = vsel %vm303_vm2, %v331_v44, %v333_v46  ;;  %v337_v52 = vrot.slane %v279_v48, 1  ;;  %v339_v55 = vrot.slane %v281_v53, 1 }
  0x1a   : > { %1134 = vmatmul.mubr.msk.f32.gmra.mxu1 %vm341_vm1, %v267_v10  ;;  %1104 = vmatprep.mubr.msk.f32.mxu0 %vm341_vm1, %v314_v21  ;;  %v336_v54 = vsel %vm303_vm2, %v333_v46, %v335_v50  ;;  %v733_v13 = vshrl.u32 %v732_v3, 7 }
  0x1b   : > { %1136 = vmatprep.mubr.msk.f32.mxu1 %vm341_vm1, %v268_v16  ;;  %v338_v56 = vsel %vm303_vm2, %v335_v50, %v337_v52  ;;  %v340_v57 = vsel %vm303_vm2, %v337_v52, %v339_v55 }
  0x1c   : > { %v742_v26 = vadd.s32 72, %v733_v13 }
  0x1d   : > { %1105 = vmatmul.mubr.msk.f32.gmra.mxu0 %vm341_vm1, %v316_v25 }
  0x1e   : > { %1137 = vmatmul.mubr.msk.f32.gmra.mxu1 %vm341_vm1, %v269_v18  ;;  %1107 = vmatprep.mubr.msk.f32.mxu0 %vm341_vm1, %v318_v27  ;;  %vm779_vm3 = vcmp.lt.s32.totalorder %v742_v26, 79 }
  0x1f   : > { %1139 = vmatprep.mubr.msk.f32.mxu1 %vm341_vm1, %v270_v23 }
  0x21   : > { %1108 = vmatmul.mubr.msk.f32.gmra.mxu0 %vm341_vm1, %v320_v31 }
  0x22   : > { %1140 = vmatmul.mubr.msk.f32.gmra.mxu1 %vm341_vm1, %v271_v24  ;;  %1110 = vmatprep.mubr.msk.f32.mxu0 %vm341_vm1, %v322_v33 }
  0x23   : > { %1142 = vmatprep.mubr.msk.f32.mxu1 %vm341_vm1, %v272_v29 }
  0x25   : > { %1111 = vmatmul.mubr.msk.f32.gmra.mxu0 %vm341_vm1, %v324_v37 }
  0x26   : > { %1113 = vmatprep.mubr.msk.f32.mxu0 %vm341_vm1, %v326_v39  ;;  %1143 = vmatmul.mubr.msk.f32.gmra.mxu1 %vm341_vm1, %v273_v30 }
  0x27   : > { %1145 = vmatprep.mubr.msk.f32.mxu1 %vm341_vm1, %v274_v35 }
  0x29   : > { %1114 = vmatmul.mubr.msk.f32.gmra.mxu0 %vm341_vm1, %v328_v43 }
  0x2a   : > { %1116 = vmatprep.mubr.msk.f32.mxu0 %vm341_vm1, %v330_v45  ;;  %1146 = vmatmul.mubr.msk.f32.gmra.mxu1 %vm341_vm1, %v275_v36 }
  0x2b   : > { %1148 = vmatprep.mubr.msk.f32.mxu1 %vm341_vm1, %v276_v41 }
  0x2d   : > { %1117 = vmatmul.mubr.msk.f32.gmra.mxu0 %vm341_vm1, %v332_v49 }
  0x2e   : > { %1119 = vmatprep.mubr.msk.f32.mxu0 %vm341_vm1, %v334_v51  ;;  %1149 = vmatmul.mubr.msk.f32.gmra.mxu1 %vm341_vm1, %v277_v42 }
  0x2f   : > { %1151 = vmatprep.mubr.msk.f32.mxu1 %vm341_vm1, %v278_v47 }
  0x31   : > { %1120 = vmatmul.mubr.msk.f32.gmra.mxu0 %vm341_vm1, %v336_v54 }
  0x32   : > { %1122 = vmatprep.mubr.msk.f32.mxu0 %vm341_vm1, %v338_v56  ;;  %1152 = vmatmul.mubr.msk.f32.gmra.mxu1 %vm341_vm1, %v279_v48 }
  0x35   : > { %1123 = vmatmul.mubr.msk.f32.gmra.mxu0 %vm341_vm1, %v340_v57 }
  0xd2   : > { %v1129_v58 = vpop.f32.mrf.mxu1 }
  0xd4   : > { %v642_v59 = vpop.f32.mrf.mxu1 }
  0xd5   : > { %v1100_v60 = vpop.f32.mrf.mxu0 }
  0xd6   : > { %v1132_v61 = vpop.f32.mrf.mxu1  ;;  %v648_v63 = vadd.f32 %v1129_v58, %v1100_v60 }
  0xd7   : > { %v448_v62 = vpop.f32.mrf.mxu0 }
  0xd8   : > { %v643_v0 = vadd.f32 %v642_v59, %v448_v62  ;;  %v652_v1 = vpop.f32.mrf.mxu1  ;;  %v866_v7 = vmul.f32 %v648_v63, %v648_v63 }
  0xd9   : > { %v1103_v2 = vpop.f32.mrf.mxu0 }
  0xda   : > { %v865_v4 = vmul.f32 %v643_v0, %v643_v0  ;;  %v1135_v5 = vpop.f32.mrf.mxu1  ;;  %v842_v8 = vadd.f32 %v648_v63, %v643_v0  ;;  %v658_v9 = vadd.f32 %v1132_v61, %v1103_v2 }
  0xdb   : > { %v458_v6 = vpop.f32.mrf.mxu0 }
  0xdc   : > { %v653_v10 = vadd.f32 %v652_v1, %v458_v6  ;;  %v662_v11 = vpop.f32.mrf.mxu1  ;;  %v883_v14 = vadd.f32 %v866_v7, %v865_v4  ;;  %v868_v20 = vmul.f32 %v658_v9, %v658_v9 }
  0xdd   : > { %v1106_v12 = vpop.f32.mrf.mxu0 }
  0xde   : > { %v843_v15 = vadd.f32 %v842_v8, %v653_v10  ;;  %v867_v16 = vmul.f32 %v653_v10, %v653_v10  ;;  %v1138_v17 = vpop.f32.mrf.mxu1  ;;  %v668_v18 = vadd.f32 %v1135_v5, %v1106_v12 }
  0xdf   : > { %v468_v19 = vpop.f32.mrf.mxu0 }
  0xe0   : > { %v884_v21 = vadd.f32 %v883_v14, %v867_v16  ;;  %v663_v22 = vadd.f32 %v662_v11, %v468_v19  ;;  %v844_v23 = vadd.f32 %v843_v15, %v658_v9  ;;  %v672_v24 = vpop.f32.mrf.mxu1  ;;  %v870_v31 = vmul.f32 %v668_v18, %v668_v18 }
  0xe1   : > { %v1109_v25 = vpop.f32.mrf.mxu0 }
  0xe2   : > { %v845_v27 = vadd.f32 %v844_v23, %v663_v22  ;;  %v869_v28 = vmul.f32 %v663_v22, %v663_v22  ;;  %v885_v29 = vadd.f32 %v884_v21, %v868_v20  ;;  %v1141_v30 = vpop.f32.mrf.mxu1  ;;  %v678_v34 = vadd.f32 %v1138_v17, %v1109_v25 }
  0xe3   : > { %v478_v32 = vpop.f32.mrf.mxu0 }
  0xe4   : > { %v886_v33 = vadd.f32 %v885_v29, %v869_v28  ;;  %v673_v35 = vadd.f32 %v672_v24, %v478_v32  ;;  %v846_v36 = vadd.f32 %v845_v27, %v668_v18  ;;  %v682_v37 = vpop.f32.mrf.mxu1  ;;  %v872_v45 = vmul.f32 %v678_v34, %v678_v34 }
  0xe5   : > { %v1112_v38 = vpop.f32.mrf.mxu0 }
  0xe6   : > { %v847_v39 = vadd.f32 %v846_v36, %v673_v35  ;;  %v871_v40 = vmul.f32 %v673_v35, %v673_v35  ;;  %v887_v41 = vadd.f32 %v886_v33, %v870_v31  ;;  %v688_v42 = vadd.f32 %v1141_v30, %v1112_v38  ;;  %v1144_v43 = vpop.f32.mrf.mxu1 }
  0xe7   : > { %v488_v44 = vpop.f32.mrf.mxu0 }
  0xe8   : > { %v888_v46 = vadd.f32 %v887_v41, %v871_v40  ;;  %v683_v47 = vadd.f32 %v682_v37, %v488_v44  ;;  %v848_v48 = vadd.f32 %v847_v39, %v678_v34  ;;  %v692_v49 = vpop.f32.mrf.mxu1  ;;  %v833_v50 = vsel %vm779_vm3, %v688_v42, 0.0 }
  0xe9   : > { %v1115_v51 = vpop.f32.mrf.mxu0  ;;  %v874_v57 = vmul.f32 %v833_v50, %v833_v50 }
  0xea   : > { %v849_v52 = vadd.f32 %v848_v48, %v683_v47  ;;  %v873_v53 = vmul.f32 %v683_v47, %v683_v47  ;;  %v889_v54 = vadd.f32 %v888_v46, %v872_v45  ;;  %v1147_v55 = vpop.f32.mrf.mxu1 }
  0xeb   : > { %v498_v56 = vpop.f32.mrf.mxu0 }
  0xec   : > { %v850_v58 = vadd.f32 %v849_v52, %v833_v50  ;;  %v890_v59 = vadd.f32 %v889_v54, %v873_v53  ;;  %v702_v60 = vpop.f32.mrf.mxu1 }
  0xed   : > { %v1118_v61 = vpop.f32.mrf.mxu0 }
  0xee   : > { %v859_v62 = vrot.slane %v850_v58, 4  ;;  %v891_v63 = vadd.f32 %v890_v59, %v874_v57  ;;  %v1150_v0 = vpop.f32.mrf.mxu1 }
  0xef   : > { %v508_v1 = vpop.f32.mrf.mxu0 }
  0xf0   : > { %v860_v2 = vadd.f32 %v859_v62, %v850_v58  ;;  %v900_v3 = vrot.slane %v891_v63, 4  ;;  %v712_v4 = vpop.f32.mrf.mxu1 }
  0xf1   : > { %v1121_v5 = vpop.f32.mrf.mxu0 }
  0xf2   : > { %v861_v6 = vrot.slane %v860_v2, 2  ;;  %v901_v7 = vadd.f32 %v900_v3, %v891_v63  ;;  %v1153_v8 = vpop.f32.mrf.mxu1 }
  0xf3   : > { %v518_v9 = vpop.f32.mrf.mxu0 }
  0xf4   : > { %v862_v10 = vadd.f32 %v861_v6, %v860_v2  ;;  %v902_v11 = vrot.slane %v901_v7, 2  ;;  %v722_v12 = vpop.f32.mrf.mxu1 }
  0xf5   : > { %v1124_v13 = vpop.f32.mrf.mxu0 }
  0xf6   : > { %v863_v14 = vrot.slane %v862_v10, 1  ;;  %v903_v15 = vadd.f32 %v902_v11, %v901_v7 }
  0xf7   : > { %v528_v16 = vpop.f32.mrf.mxu0 }
  0xf8   : > { %v904_v17 = vrot.slane %v903_v15, 1  ;;  %v864_v18 = vadd.f32 %v863_v14, %v862_v10 }
  0xfa   : > { %v905_v19 = vadd.f32 %v904_v17, %v903_v15 }
  0xfc   : > { %v907_v20 = vsel %vm906_vm4, %v864_v18, %v905_v19 }
  0xfd   : > { %v909_v21 = vsel %vm908_vm5, %v907_v20, 0.0 }
  0xfe   : > { %914 = vst [vmem:[%s261_s4] sm:$0xff] %v909_v21 }
  0xff PF: > { %s13_s14 = sadd.s32 1, %s1203_s14   ;;  %s1353_s12 = smov %s1199_s13 }
 0x100   : > { %p10_p5 = scmp.ge.s32.totalorder %s13_s14, 4   ;;  %s1354_s13 = smov %s1356_s15 }
 0x102   :  { %12 = sbr.rel (!%p10_p5) target bundleno = 2 (0x2), region = 74 }

// kernel: wav2vec2_feature_extractor.6
= control target key start
LH: loop header
LB: loop body
LE: loop exit
PB: predicated region body
PF: predicated region fallthrough
CT: control target
= control target key end

     0   :  { %s1052_s12 = smov 0   ;;  %s1054_s13 = smov 0   ;;  %s1333_s0 = inlined_call_operand.vmem [shape: f32[2,72,256], index: 0, kind: input, shape index: {}, may-alias: {0,1}]   ;;  %s1334_s1 = inlined_call_operand.vmem [shape: f32[2,72,256], index: 1, kind: input, shape index: {}, may-alias: {0,1}]   ;;  %s1335_s2 = inlined_call_operand.vmem [shape: f32[2,256,128], index: 2, kind: input, shape index: {}]   ;;  %s1336_s3 = inlined_call_operand.vmem [shape: f32[2,64,128], index: 3, kind: output, shape index: {}]  }
   0x1   :  { %s1056_s14 = smov 0  }
   0x2 LB: > { %s25_s15 = sadd.s32 1, %s1026_s13  ;;  %p811_p0 = scmp.ge.s32.totalorder %s1030_s14, 1  ;;  %s1030_s14 = sphi %s1056_s14, %s13_s14   ;;  %s1026_s13 = sphi %s1054_s13, %s1338_s13   ;;  %s1022_s12 = sphi %s1052_s12, %s1337_s12  }
   0x3   : > { %p27_p1 = scmp.ge.s32.totalorder %s25_s15, 2  ;;  %p193_p2 = scmp.lt.s32.totalorder %s1030_s14, 3 }
   0x5   : > { %s1340_s15 = smov (%p27_p1, %s25_s15), 0  ;;  %p194_p3 = pnand %p811_p0, %p193_p2 }
   0x6   : > { %p248_p4 = scmp.lt.s32.totalorder (!%p194_p3), %s1022_s12, 1 }
   0x7   : > { %197 = sbr.rel (%p194_p3) target bundleno = 296 (0x128), region = 32 }
   0xc   : > { %v847_v0 = vld [vmem:[%s1335_s2 + $0x1f8] sm:$0xff]  ;;  %v846_v4 = vld [vmem:[%s1335_s2 + $0x1f0] sm:$0xff]  ;;  %v845_v8 = vld [vmem:[%s1335_s2 + $0x1e8] sm:$0xff]  ;;  %s1342_s12 = smov (!%p248_p4, %s1022_s12), 1  ;;  %vm387_vm0 = vcmask 1046528  }
   0xd   : > { %v333_v1 = vld [vmem:[%s1335_s2 + $0xf8] sm:$0xff]  ;;  %853 = vmatprep.subr.mxu0 %v847_v0  ;;  %v332_v5 = vld [vmem:[%s1335_s2 + $0xf0] sm:$0xff]  ;;  %v331_v9 = vld [vmem:[%s1335_s2 + $0xe8] sm:$0xff]  ;;  %s965_s19 = smul.u32 144, %s1342_s12 }
   0xe   : > { %v831_v2 = vld [vmem:[%s1335_s2 + $0x178] sm:$0xff]  ;;  %909 = vmatprep.subr.mxu1 %v333_v1  ;;  %v830_v6 = vld [vmem:[%s1335_s2 + $0x170] sm:$0xff]  ;;  %v829_v10 = vld [vmem:[%s1335_s2 + $0x168] sm:$0xff] }
   0xf   : > { %v317_v3 = vld [vmem:[%s1335_s2 + $0x78] sm:$0xff]  ;;  %854 = vmatpush3.msra.mxu0 %v831_v2  ;;  %v316_v7 = vld [vmem:[%s1335_s2 + $0x70] sm:$0xff]  ;;  %v315_v11 = vld [vmem:[%s1335_s2 + $0x68] sm:$0xff]  ;;  %s1211_s11 = scalar_lea.vmem %s1333_s0, %s965_s19  ;;  %s851_s9 = sadd.s32 128, %s965_s19 }
  0x10   : > { %910 = vmatpush3.msra.mxu1 %v317_v3  ;;  %855 = vmatprep.subr.mxu0 %v846_v4  ;;  %v844_v12 = vld [vmem:[%s1335_s2 + $0x1e0] sm:$0xff]  ;;  %v843_v16 = vld [vmem:[%s1335_s2 + $0x1d8] sm:$0xff]  ;;  %v842_v20 = vld [vmem:[%s1335_s2 + $0x1d0] sm:$0xff]  ;;  %s273_s17 = scalar_lea.vmem %s1334_s1, %s851_s9  ;;  %s852_s19 = sshll.u32 %s1342_s12, 6 }
  0x11   : > { %911 = vmatprep.subr.mxu1 %v332_v5  ;;  %856 = vmatpush3.msra.mxu0 %v830_v6  ;;  %v330_v13 = vld [vmem:[%s1335_s2 + $0xe0] sm:$0xff]  ;;  %v329_v17 = vld [vmem:[%s1335_s2 + $0xd8] sm:$0xff]  ;;  %v328_v21 = vld [vmem:[%s1335_s2 + $0xd0] sm:$0xff]  ;;  %s1314_s20 = scalar_lea.vmem %s1336_s3, %s852_s19 }
  0x12   : > { %912 = vmatpush3.msra.mxu1 %v316_v7  ;;  %857 = vmatprep.subr.mxu0 %v845_v8  ;;  %v828_v14 = vld [vmem:[%s1335_s2 + $0x160] sm:$0xff]  ;;  %v827_v18 = vld [vmem:[%s1335_s2 + $0x158] sm:$0xff]  ;;  %v826_v22 = vld [vmem:[%s1335_s2 + $0x150] sm:$0xff] }
  0x13   : > { %913 = vmatprep.subr.mxu1 %v331_v9  ;;  %v314_v15 = vld [vmem:[%s1335_s2 + $0x60] sm:$0xff]  ;;  %858 = vmatpush3.msra.mxu0 %v829_v10  ;;  %v313_v19 = vld [vmem:[%s1335_s2 + $0x58] sm:$0xff]  ;;  %v312_v23 = vld [vmem:[%s1335_s2 + $0x50] sm:$0xff] }
  0x14   : > { %914 = vmatpush3.msra.mxu1 %v315_v11  ;;  %859 = vmatprep.subr.mxu0 %v844_v12  ;;  %v841_v24 = vld [vmem:[%s1335_s2 + $0x1c8] sm:$0xff]  ;;  %v840_v28 = vld [vmem:[%s1335_s2 + $0x1c0] sm:$0xff]  ;;  %v839_v32 = vld [vmem:[%s1335_s2 + $0x1b8] sm:$0xff] }
  0x15   : > { %915 = vmatprep.subr.mxu1 %v330_v13  ;;  %860 = vmatpush3.msra.mxu0 %v828_v14  ;;  %v327_v25 = vld [vmem:[%s1335_s2 + $0xc8] sm:$0xff]  ;;  %v326_v29 = vld [vmem:[%s1335_s2 + $0xc0] sm:$0xff]  ;;  %v325_v33 = vld [vmem:[%s1335_s2 + $0xb8] sm:$0xff] }
  0x16   : > { %916 = vmatpush3.msra.mxu1 %v314_v15  ;;  %861 = vmatprep.subr.mxu0 %v843_v16  ;;  %v825_v26 = vld [vmem:[%s1335_s2 + $0x148] sm:$0xff]  ;;  %v824_v30 = vld [vmem:[%s1335_s2 + $0x140] sm:$0xff]  ;;  %v823_v34 = vld [vmem:[%s1335_s2 + $0x138] sm:$0xff] }
  0x17   : > { %917 = vmatprep.subr.mxu1 %v329_v17  ;;  %862 = vmatpush3.msra.mxu0 %v827_v18  ;;  %v311_v27 = vld [vmem:[%s1335_s2 + $0x48] sm:$0xff]  ;;  %v310_v31 = vld [vmem:[%s1335_s2 + $0x40] sm:$0xff]  ;;  %v309_v35 = vld [vmem:[%s1335_s2 + $0x38] sm:$0xff] }
  0x18   : > { %918 = vmatpush3.msra.mxu1 %v313_v19  ;;  %863 = vmatprep.subr.mxu0 %v842_v20  ;;  %v838_v36 = vld [vmem:[%s1335_s2 + $0x1b0] sm:$0xff]  ;;  %v837_v40 = vld [vmem:[%s1335_s2 + $0x1a8] sm:$0xff]  ;;  %v836_v44 = vld [vmem:[%s1335_s2 + $0x1a0] sm:$0xff] }
  0x19   : > { %919 = vmatprep.subr.mxu1 %v328_v21  ;;  %864 = vmatpush3.msra.mxu0 %v826_v22  ;;  %v324_v37 = vld [vmem:[%s1335_s2 + $0xb0] sm:$0xff]  ;;  %v323_v41 = vld [vmem:[%s1335_s2 + $0xa8] sm:$0xff]  ;;  %v322_v45 = vld [vmem:[%s1335_s2 + $0xa0] sm:$0xff] }
  0x1a   : > { %920 = vmatpush3.msra.mxu1 %v312_v23  ;;  %865 = vmatprep.subr.mxu0 %v841_v24  ;;  %v822_v38 = vld [vmem:[%s1335_s2 + $0x130] sm:$0xff]  ;;  %v821_v42 = vld [vmem:[%s1335_s2 + $0x128] sm:$0xff]  ;;  %v820_v46 = vld [vmem:[%s1335_s2 + $0x120] sm:$0xff] }
  0x1b   : > { %921 = vmatprep.subr.mxu1 %v327_v25  ;;  %866 = vmatpush3.msra.mxu0 %v825_v26  ;;  %v308_v39 = vld [vmem:[%s1335_s2 + $0x30] sm:$0xff]  ;;  %v307_v43 = vld [vmem:[%s1335_s2 + $0x28] sm:$0xff]  ;;  %v306_v47 = vld [vmem:[%s1335_s2 + $0x20] sm:$0xff] }
  0x1c   : > { %922 = vmatpush3.msra.mxu1 %v311_v27  ;;  %867 = vmatprep.subr.mxu0 %v840_v28  ;;  %v835_v48 = vld [vmem:[%s1335_s2 + $0x198] sm:$0xff]  ;;  %v287_v50 = vld [vmem:[%s1211_s11 + $0x8] sm:$0xff]  ;;  %v834_v54 = vld [vmem:[%s1335_s2 + $0x190] sm:$0xff] }
  0x1d   : > { %923 = vmatprep.subr.mxu1 %v326_v29  ;;  %868 = vmatpush3.msra.mxu0 %v824_v30  ;;  %v321_v49 = vld [vmem:[%s1335_s2 + $0x98] sm:$0xff]  ;;  %v320_v55 = vld [vmem:[%s1335_s2 + $0x90] sm:$0xff]  ;;  %v286_v56 = vld [vmem:[%s1211_s11] sm:$0xff]  ;;  %v391_v60 = vrot.slane %v287_v50, 1 }
  0x1e   : > { %924 = vmatpush3.msra.mxu1 %v310_v31  ;;  %869 = vmatprep.subr.mxu0 %v839_v32  ;;  %v289_v51 = vld [vmem:[%s1211_s11 + $0x18] sm:$0xff]  ;;  %v288_v57 = vld [vmem:[%s1211_s11 + $0x10] sm:$0xff]  ;;  %v291_v62 = vld [vmem:[%s1211_s11 + $0x28] sm:$0xff]  ;;  %v388_v3 = vrot.slane %v286_v56, 1 }
  0x1f   : > { %925 = vmatprep.subr.mxu1 %v325_v33  ;;  %870 = vmatpush3.msra.mxu0 %v823_v34  ;;  %v819_v52 = vld [vmem:[%s1335_s2 + $0x118] sm:$0xff]  ;;  %v818_v58 = vld [vmem:[%s1335_s2 + $0x110] sm:$0xff]  ;;  %v392_v61 = vrot.slane %v289_v51, 1  ;;  %v833_v63 = vld [vmem:[%s1335_s2 + $0x188] sm:$0xff]  ;;  %v389_v4 = vrot.slane %v288_v57, 1  ;;  %v396_v7 = vrot.slane %v291_v62, 1 }
  0x20   : > { %926 = vmatpush3.msra.mxu1 %v309_v35  ;;  %871 = vmatprep.subr.mxu0 %v838_v36  ;;  %v305_v53 = vld [vmem:[%s1335_s2 + $0x18] sm:$0xff]  ;;  %v304_v59 = vld [vmem:[%s1335_s2 + $0x10] sm:$0xff]  ;;  %v319_v0 = vld [vmem:[%s1335_s2 + $0x88] sm:$0xff] }
  0x21   : > { %927 = vmatprep.subr.mxu1 %v324_v37  ;;  %872 = vmatpush3.msra.mxu0 %v822_v38  ;;  %v817_v1 = vld [vmem:[%s1335_s2 + $0x108] sm:$0xff]  ;;  %v832_v5 = vld [vmem:[%s1335_s2 + $0x180] sm:$0xff]  ;;  %v393_v10 = vsel %vm387_vm0, %v391_v60, %v392_v61  ;;  %v293_v11 = vld [vmem:[%s1211_s11 + $0x38] sm:$0xff]  ;;  %v390_v13 = vsel %vm387_vm0, %v388_v3, %v389_v4  ;;  %v397_v15 = vsel %vm387_vm0, %v392_v61, %v396_v7 }
  0x22   : > { %928 = vmatpush3.msra.mxu1 %v308_v39  ;;  %873 = vmatprep.subr.mxu0 %v837_v40  ;;  %v303_v2 = vld [vmem:[%s1335_s2 + $0x8] sm:$0xff]  ;;  %v318_v6 = vld [vmem:[%s1335_s2 + $0x80] sm:$0xff]  ;;  %v400_v16 = vrot.slane %v293_v11, 1  ;;  %v292_v17 = vld [vmem:[%s1211_s11 + $0x30] sm:$0xff] }
  0x23   : > { %929 = vmatprep.subr.mxu1 %v323_v41  ;;  %874 = vmatpush3.msra.mxu0 %v821_v42  ;;  %v290_v8 = vld [vmem:[%s1211_s11 + $0x20] sm:$0xff]  ;;  %v295_v18 = vld [vmem:[%s1211_s11 + $0x48] sm:$0xff]  ;;  %v398_v20 = vrot.slane %v292_v17, 1  ;;  %v297_v24 = vld [vmem:[%s1211_s11 + $0x58] sm:$0xff] }
  0x24   : > { %930 = vmatpush3.msra.mxu1 %v307_v43  ;;  %875 = vmatprep.subr.mxu0 %v836_v44  ;;  %v816_v9 = vld [vmem:[%s1335_s2 + $0x100] sm:$0xff]  ;;  %v394_v14 = vrot.slane %v290_v8, 1  ;;  %v401_v21 = vsel %vm387_vm0, %v396_v7, %v400_v16  ;;  %v404_v22 = vrot.slane %v295_v18, 1  ;;  %v408_v28 = vrot.slane %v297_v24, 1  ;;  %v296_v29 = vld [vmem:[%s1211_s11 + $0x50] sm:$0xff]  ;;  %v299_v30 = vld [vmem:[%s1211_s11 + $0x68] sm:$0xff] }
  0x25   : > { %931 = vmatprep.subr.mxu1 %v322_v45  ;;  %876 = vmatpush3.msra.mxu0 %v820_v46  ;;  %v302_v12 = vld [vmem:[%s1335_s2] sm:$0xff]  ;;  %v406_v32 = vrot.slane %v296_v29, 1  ;;  %v412_v34 = vrot.slane %v299_v30, 1  ;;  %v301_v36 = vld [vmem:[%s1211_s11 + $0x78] sm:$0xff]  ;;  %v300_v41 = vld [vmem:[%s1211_s11 + $0x70] sm:$0xff] }
  0x26   : > { %932 = vmatpush3.msra.mxu1 %v306_v47  ;;  %877 = vmatprep.subr.mxu0 %v835_v48  ;;  %v395_v19 = vsel %vm387_vm0, %v389_v4, %v394_v14  ;;  %v294_v23 = vld [vmem:[%s1211_s11 + $0x40] sm:$0xff]  ;;  %v399_v25 = vsel %vm387_vm0, %v394_v14, %v398_v20  ;;  %v405_v27 = vsel %vm387_vm0, %v400_v16, %v404_v22  ;;  %v416_v40 = vrot.slane %v301_v36, 1  ;;  %v335_v42 = vld [vmem:[%s273_s17 + $0x8] sm:$0xff] }
  0x27   : > { %933 = vmatprep.subr.mxu1 %v321_v49  ;;  %878 = vmatpush3.msra.mxu0 %v819_v52  ;;  %v402_v26 = vrot.slane %v294_v23, 1  ;;  %v409_v33 = vsel %vm387_vm0, %v404_v22, %v408_v28  ;;  %v298_v35 = vld [vmem:[%s1211_s11 + $0x60] sm:$0xff]  ;;  %v413_v39 = vsel %vm387_vm0, %v408_v28, %v412_v34  ;;  %v414_v44 = vrot.slane %v300_v41, 1 }
  0x28   : > { %934 = vmatpush3.msra.mxu1 %v305_v53  ;;  %879 = vmatprep.subr.mxu0 %v834_v54  ;;  %v410_v38 = vrot.slane %v298_v35, 1  ;;  %v417_v45 = vsel %vm387_vm0, %v412_v34, %v416_v40  ;;  %v420_v46 = vrot.slane %v335_v42, 1  ;;  %v334_v47 = vld [vmem:[%s273_s17] sm:$0xff] }
  0x29   : > { %935 = vmatprep.subr.mxu1 %v320_v55  ;;  %880 = vmatpush3.msra.mxu0 %v818_v58  ;;  %v403_v31 = vsel %vm387_vm0, %v398_v20, %v402_v26  ;;  %v407_v37 = vsel %vm387_vm0, %v402_v26, %v406_v32  ;;  %v418_v49 = vrot.slane %v334_v47, 1 }
  0x2a   : > { %936 = vmatpush3.msra.mxu1 %v304_v59  ;;  %881 = vmatprep.subr.mxu0 %v833_v63  ;;  %v411_v43 = vsel %vm387_vm0, %v406_v32, %v410_v38  ;;  %v415_v48 = vsel %vm387_vm0, %v410_v38, %v414_v44 }
  0x2b   : > { %937 = vmatprep.subr.mxu1 %v319_v0  ;;  %882 = vmatpush3.msra.mxu0 %v817_v1 }
  0x2c   : > { %938 = vmatpush3.msra.mxu1 %v303_v2  ;;  %883 = vmatprep.subr.mxu0 %v832_v5 }
  0x2d   : > { %939 = vmatprep.subr.mxu1 %v318_v6  ;;  %884 = vmatpush3.msra.mxu0 %v816_v9 }
  0x2e   : > { %502 = vmatprep.mubr.f32.mxu0 %v393_v10  ;;  %940 = vmatpush3.msra.mxu1 %v302_v12 }
  0x2f   : > { %607 = vmatprep.mubr.f32.mxu1 %v287_v50  ;;  %503 = vmatmul.mubr.f32.vlgmr.msra.gmra.mxu0 %v390_v13  ;;  %v421_v50 = vsel %vm387_vm0, %v416_v40, %v420_v46 }
  0x30   : > { %608 = vmatmul.mubr.f32.vlgmr.msra.gmra.mxu1 %v286_v56  ;;  %507 = vmatprep.mubr.f32.mxu0 %v397_v15 }
  0x31   : > { %612 = vmatprep.mubr.f32.mxu1 %v289_v51  ;;  %v419_v51 = vsel %vm387_vm0, %v414_v44, %v418_v49 }
  0x33   : > { %508 = vmatmul.mubr.f32.gmra.mxu0 %v395_v19 }
  0x34   : > { %613 = vmatmul.mubr.f32.gmra.mxu1 %v288_v57  ;;  %512 = vmatprep.mubr.f32.mxu0 %v401_v21 }
  0x35   : > { %617 = vmatprep.mubr.f32.mxu1 %v291_v62 }
  0x37   : > { %513 = vmatmul.mubr.f32.gmra.mxu0 %v399_v25 }
  0x38   : > { %618 = vmatmul.mubr.f32.gmra.mxu1 %v290_v8  ;;  %517 = vmatprep.mubr.f32.mxu0 %v405_v27 }
  0x39   : > { %622 = vmatprep.mubr.f32.mxu1 %v293_v11 }
  0x3b   : > { %518 = vmatmul.mubr.f32.gmra.mxu0 %v403_v31 }
  0x3c   : > { %623 = vmatmul.mubr.f32.gmra.mxu1 %v292_v17  ;;  %522 = vmatprep.mubr.f32.mxu0 %v409_v33 }
  0x3d   : > { %627 = vmatprep.mubr.f32.mxu1 %v295_v18 }
  0x3f   : > { %523 = vmatmul.mubr.f32.gmra.mxu0 %v407_v37 }
  0x40   : > { %628 = vmatmul.mubr.f32.gmra.mxu1 %v294_v23  ;;  %527 = vmatprep.mubr.f32.mxu0 %v413_v39 }
  0x41   : > { %632 = vmatprep.mubr.f32.mxu1 %v297_v24 }
  0x43   : > { %528 = vmatmul.mubr.f32.gmra.mxu0 %v411_v43 }
  0x44   : > { %633 = vmatmul.mubr.f32.gmra.mxu1 %v296_v29  ;;  %532 = vmatprep.mubr.f32.mxu0 %v417_v45 }
  0x45   : > { %637 = vmatprep.mubr.f32.mxu1 %v299_v30 }
  0x47   : > { %533 = vmatmul.mubr.f32.gmra.mxu0 %v415_v48 }
  0x48   : > { %638 = vmatmul.mubr.f32.gmra.mxu1 %v298_v35  ;;  %537 = vmatprep.mubr.f32.mxu0 %v421_v50 }
  0x49   : > { %642 = vmatprep.mubr.f32.mxu1 %v301_v36 }
  0x4b   : > { %538 = vmatmul.mubr.f32.gmra.mxu0 %v419_v51 }
  0x4c   : > { %643 = vmatmul.mubr.f32.gmra.mxu1 %v300_v41 }
  0xef   : > { %v885_v52 = vpop.f32.mrf.mxu0 }
  0xf0   : > { %v941_v53 = vpop.f32.mrf.mxu1 }
  0xf1   : > { %v886_v54 = vpop.f32.mrf.mxu0 }
  0xf2   : > { %v942_v55 = vpop.f32.mrf.mxu1  ;;  %v887_v56 = vadd.f32 %v886_v54, %v885_v52 }
  0xf3   : > { %v943_v57 = vadd.f32 %v942_v55, %v941_v53  ;;  %v888_v58 = vpop.f32.mrf.mxu0 }
  0xf4   : > { %v944_v59 = vpop.f32.mrf.mxu1 }
  0xf5   : > { %v610_v60 = vadd.f32 %v943_v57, %v887_v56  ;;  %v889_v61 = vpop.f32.mrf.mxu0 }
  0xf6   : > { %v945_v62 = vpop.f32.mrf.mxu1  ;;  %v890_v0 = vadd.f32 %v889_v61, %v888_v58 }
  0xf7   : > { %v656_v63 = vmul.f32 0.70710677, %v610_v60  ;;  %v946_v1 = vadd.f32 %v945_v62, %v944_v59  ;;  %v891_v2 = vpop.f32.mrf.mxu0  ;;  %v648_v32 = vmul.f32 0.5, %v610_v60 }
  0xf8   : > { %v947_v3 = vpop.f32.mrf.mxu1 }
  0xf9   : > { %992 = verf.f32 %v656_v63  ;;  %v615_v4 = vadd.f32 %v946_v1, %v890_v0  ;;  %v892_v5 = vpop.f32.mrf.mxu0 }
  0xfa   : > { %v948_v6 = vpop.f32.mrf.mxu1  ;;  %v893_v8 = vadd.f32 %v892_v5, %v891_v2 }
  0xfb   : > { %v657_v7 = vmul.f32 0.70710677, %v615_v4  ;;  %v949_v9 = vadd.f32 %v948_v6, %v947_v3  ;;  %v894_v10 = vpop.f32.mrf.mxu0  ;;  %v649_v44 = vmul.f32 0.5, %v615_v4 }
  0xfc   : > { %v950_v11 = vpop.f32.mrf.mxu1 }
  0xfd   : > { %994 = verf.f32 %v657_v7  ;;  %v620_v12 = vadd.f32 %v949_v9, %v893_v8  ;;  %v895_v13 = vpop.f32.mrf.mxu0 }
  0xfe   : > { %v951_v14 = vpop.f32.mrf.mxu1  ;;  %v896_v16 = vadd.f32 %v895_v13, %v894_v10 }
  0xff   : > { %v658_v15 = vmul.f32 0.70710677, %v620_v12  ;;  %v952_v17 = vadd.f32 %v951_v14, %v950_v11  ;;  %v897_v18 = vpop.f32.mrf.mxu0  ;;  %v650_v56 = vmul.f32 0.5, %v620_v12 }
 0x100   : > { %v953_v19 = vpop.f32.mrf.mxu1 }
 0x101   : > { %996 = verf.f32 %v658_v15  ;;  %v625_v20 = vadd.f32 %v952_v17, %v896_v16  ;;  %v898_v21 = vpop.f32.mrf.mxu0 }
 0x102   : > { %v954_v22 = vpop.f32.mrf.mxu1  ;;  %v899_v24 = vadd.f32 %v898_v21, %v897_v18 }
 0x103   : > { %v659_v23 = vmul.f32 0.70710677, %v625_v20  ;;  %v955_v25 = vadd.f32 %v954_v22, %v953_v19  ;;  %v900_v26 = vpop.f32.mrf.mxu0  ;;  %v651_v0 = vmul.f32 0.5, %v625_v20 }
 0x104   : > { %v956_v27 = vpop.f32.mrf.mxu1 }
 0x105   : > { %998 = verf.f32 %v659_v23  ;;  %v630_v28 = vadd.f32 %v955_v25, %v899_v24  ;;  %v901_v30 = vpop.f32.mrf.mxu0 }
 0x106   : > { %v993_v29 = vpop.eup %992  ;;  %v957_v31 = vpop.f32.mrf.mxu1  ;;  %v902_v35 = vadd.f32 %v901_v30, %v900_v26 }
 0x107   : > { %v672_v33 = vadd.f32 1.0, %v993_v29  ;;  %v660_v34 = vmul.f32 0.70710677, %v630_v28  ;;  %v958_v36 = vadd.f32 %v957_v31, %v956_v27  ;;  %v903_v37 = vpop.f32.mrf.mxu0  ;;  %v652_v5 = vmul.f32 0.5, %v630_v28 }
 0x108   : > { %v959_v38 = vpop.f32.mrf.mxu1 }
 0x109   : > { %v680_v39 = vmul.f32 %v672_v33, %v648_v32  ;;  %1000 = verf.f32 %v660_v34  ;;  %v635_v41 = vadd.f32 %v958_v36, %v902_v35  ;;  %v904_v42 = vpop.f32.mrf.mxu0 }
 0x10a   : > { %v995_v40 = vpop.eup %994  ;;  %v960_v43 = vpop.f32.mrf.mxu1  ;;  %v905_v46 = vadd.f32 %v904_v42, %v903_v37 }
 0x10b   : > { %688 = vst [vmem:[%s1314_s20] sm:$0xff] %v680_v39  ;;  %v673_v45 = vadd.f32 1.0, %v995_v40  ;;  %v961_v47 = vadd.f32 %v960_v43, %v959_v38  ;;  %v661_v48 = vmul.f32 0.70710677, %v635_v41  ;;  %v906_v49 = vpop.f32.mrf.mxu0  ;;  %v653_v9 = vmul.f32 0.5, %v635_v41 }
 0x10c   : > { %v962_v50 = vpop.f32.mrf.mxu1 }
 0x10d   : > { %v681_v51 = vmul.f32 %v673_v45, %v649_v44  ;;  %v640_v52 = vadd.f32 %v961_v47, %v905_v46  ;;  %1002 = verf.f32 %v661_v48  ;;  %v907_v54 = vpop.f32.mrf.mxu0 }
 0x10e   : > { %v997_v53 = vpop.eup %996  ;;  %v963_v55 = vpop.f32.mrf.mxu1  ;;  %v908_v59 = vadd.f32 %v907_v54, %v906_v49 }
 0x10f   : > { %689 = vst [vmem:[%s1314_s20 + $0x8] sm:$0xff] %v681_v51  ;;  %v674_v57 = vadd.f32 1.0, %v997_v53  ;;  %v662_v58 = vmul.f32 0.70710677, %v640_v52  ;;  %v964_v60 = vadd.f32 %v963_v55, %v962_v50  ;;  %v654_v13 = vmul.f32 0.5, %v640_v52 }
 0x111   : > { %v682_v61 = vmul.f32 %v674_v57, %v650_v56  ;;  %1004 = verf.f32 %v662_v58  ;;  %v645_v63 = vadd.f32 %v964_v60, %v908_v59 }
 0x112   : > { %v999_v62 = vpop.eup %998 }
 0x113   : > { %690 = vst [vmem:[%s1314_s20 + $0x10] sm:$0xff] %v682_v61  ;;  %v675_v1 = vadd.f32 1.0, %v999_v62  ;;  %v663_v2 = vmul.f32 0.70710677, %v645_v63  ;;  %v655_v17 = vmul.f32 0.5, %v645_v63 }
 0x115   : > { %v683_v3 = vmul.f32 %v675_v1, %v651_v0  ;;  %1006 = verf.f32 %v663_v2 }
 0x116   : > { %v1001_v4 = vpop.eup %1000 }
 0x117   : > { %691 = vst [vmem:[%s1314_s20 + $0x18] sm:$0xff] %v683_v3  ;;  %v676_v6 = vadd.f32 1.0, %v1001_v4 }
 0x119   : > { %v684_v7 = vmul.f32 %v676_v6, %v652_v5 }
 0x11a   : > { %v1003_v8 = vpop.eup %1002 }
 0x11b   : > { %692 = vst [vmem:[%s1314_s20 + $0x20] sm:$0xff] %v684_v7  ;;  %v677_v10 = vadd.f32 1.0, %v1003_v8 }
 0x11d   : > { %v685_v12 = vmul.f32 %v677_v10, %v653_v9 }
 0x11e   : > { %v1005_v11 = vpop.eup %1004 }
 0x11f   : > { %v678_v14 = vadd.f32 1.0, %v1005_v11  ;;  %693 = vst [vmem:[%s1314_s20 + $0x28] sm:$0xff] %v685_v12 }
 0x121   : > { %v686_v15 = vmul.f32 %v678_v14, %v654_v13 }
 0x122   : > { %v1007_v16 = vpop.eup %1006 }
 0x123   : > { %694 = vst [vmem:[%s1314_s20 + $0x30] sm:$0xff] %v686_v15  ;;  %v679_v18 = vadd.f32 1.0, %v1007_v16 }
 0x125   : > { %v687_v19 = vmul.f32 %v679_v18, %v655_v17 }
 0x127   : > { %695 = vst [vmem:[%s1314_s20 + $0x38] sm:$0xff] %v687_v19 }
 0x128 PF: > { %s13_s14 = sadd.s32 1, %s1030_s14   ;;  %s1337_s12 = smov %s1026_s13 }
 0x129   : > { %p10_p5 = scmp.ge.s32.totalorder %s13_s14, 4   ;;  %s1338_s13 = smov %s1340_s15 }
 0x12b   :  { %12 = sbr.rel (!%p10_p5) target bundleno = 2 (0x2), region = 66 }

// kernel: wav2vec2_feature_extractor.7
= control target key start
LH: loop header
LB: loop body
LE: loop exit
PB: predicated region body
PF: predicated region fallthrough
CT: control target
= control target key end

     0   :  { %s692_s12 = smov 0   ;;  %s694_s13 = smov 0   ;;  %s829_s0 = inlined_call_operand.vmem [shape: f32[2,32,256], index: 0, kind: input, shape index: {}, may-alias: {0,1}]   ;;  %s830_s1 = inlined_call_operand.vmem [shape: f32[2,32,256], index: 1, kind: input, shape index: {}, may-alias: {0,1}]   ;;  %s831_s2 = inlined_call_operand.vmem [shape: f32[1,256,128], index: 2, kind: input, shape index: {}]   ;;  %s832_s3 = inlined_call_operand.vmem [shape: f32[2,24,128], index: 3, kind: output, shape index: {}]  }
   0x1   :  { %s696_s14 = smov 0  }
   0x2 LB: > { %s25_s1 = sadd.s32 1, %s666_s13  ;;  %p537_p0 = scmp.ge.s32.totalorder %s670_s14, 1  ;;  %s670_s14 = sphi %s696_s14, %s13_s14   ;;  %s666_s13 = sphi %s694_s13, %s834_s13   ;;  %s662_s12 = sphi %s692_s12, %s833_s12  }
   0x3   : > { %p27_p1 = scmp.ge.s32.totalorder %s25_s1, 2  ;;  %p193_p2 = scmp.lt.s32.totalorder %s670_s14, 3 }
   0x5   : > { %s836_s1 = smov (%p27_p1, %s25_s1), 0  ;;  %p194_p3 = pnand %p537_p0, %p193_p2 }
   0x6   : > { %p248_p4 = scmp.lt.s32.totalorder (!%p194_p3), %s662_s12, 1 }
   0x7   : > { %197 = sbr.rel (%p194_p3) target bundleno = 268 (0x10c), region = 32 }
   0xc   : > { %v323_v0 = vld [vmem:[%s831_s2 + $0xf8] sm:$0xff]  ;;  %v322_v2 = vld [vmem:[%s831_s2 + $0xf0] sm:$0xff]  ;;  %v321_v4 = vld [vmem:[%s831_s2 + $0xe8] sm:$0xff]  ;;  %s838_s12 = smov (!%p248_p4, %s662_s12), 1 }
   0xd   : > { %v307_v1 = vld [vmem:[%s831_s2 + $0x78] sm:$0xff]  ;;  %544 = vmatprep.subr.mxu0 %v323_v0  ;;  %585 = vmatprep.subr.mxu1 %v323_v0  ;;  %v306_v3 = vld [vmem:[%s831_s2 + $0x70] sm:$0xff]  ;;  %v305_v5 = vld [vmem:[%s831_s2 + $0x68] sm:$0xff]  ;;  %s543_s21 = sshll.u32 %s838_s12, 6  ;;  %s617_s8 = smul.u32 24, %s838_s12 }
   0xe   : > { %545 = vmatpush3.msra.mxu0 %v307_v1  ;;  %601 = vmatpush3.msra.mxu1 %v307_v1  ;;  %v320_v6 = vld [vmem:[%s831_s2 + $0xe0] sm:$0xff]  ;;  %v319_v8 = vld [vmem:[%s831_s2 + $0xd8] sm:$0xff]  ;;  %v318_v10 = vld [vmem:[%s831_s2 + $0xd0] sm:$0xff]  ;;  %s256_s30 = scalar_lea.vmem %s829_s0, %s543_s21 }
   0xf   : > { %546 = vmatprep.subr.mxu0 %v322_v2  ;;  %586 = vmatprep.subr.mxu1 %v322_v2  ;;  %v304_v7 = vld [vmem:[%s831_s2 + $0x60] sm:$0xff]  ;;  %v303_v9 = vld [vmem:[%s831_s2 + $0x58] sm:$0xff]  ;;  %v302_v11 = vld [vmem:[%s831_s2 + $0x50] sm:$0xff]  ;;  %s284_s11 = scalar_lea.vmem %s832_s3, %s617_s8 }
  0x10   : > { %547 = vmatpush3.msra.mxu0 %v306_v3  ;;  %602 = vmatpush3.msra.mxu1 %v306_v3  ;;  %v317_v12 = vld [vmem:[%s831_s2 + $0xc8] sm:$0xff]  ;;  %v316_v14 = vld [vmem:[%s831_s2 + $0xc0] sm:$0xff]  ;;  %v315_v16 = vld [vmem:[%s831_s2 + $0xb8] sm:$0xff] }
  0x11   : > { %548 = vmatprep.subr.mxu0 %v321_v4  ;;  %587 = vmatprep.subr.mxu1 %v321_v4  ;;  %v301_v13 = vld [vmem:[%s831_s2 + $0x48] sm:$0xff]  ;;  %v300_v15 = vld [vmem:[%s831_s2 + $0x40] sm:$0xff]  ;;  %v299_v17 = vld [vmem:[%s831_s2 + $0x38] sm:$0xff] }
  0x12   : > { %549 = vmatpush3.msra.mxu0 %v305_v5  ;;  %603 = vmatpush3.msra.mxu1 %v305_v5  ;;  %v314_v18 = vld [vmem:[%s831_s2 + $0xb0] sm:$0xff]  ;;  %v313_v20 = vld [vmem:[%s831_s2 + $0xa8] sm:$0xff]  ;;  %v312_v22 = vld [vmem:[%s831_s2 + $0xa0] sm:$0xff] }
  0x13   : > { %550 = vmatprep.subr.mxu0 %v320_v6  ;;  %588 = vmatprep.subr.mxu1 %v320_v6  ;;  %v298_v19 = vld [vmem:[%s831_s2 + $0x30] sm:$0xff]  ;;  %v297_v21 = vld [vmem:[%s831_s2 + $0x28] sm:$0xff]  ;;  %v296_v23 = vld [vmem:[%s831_s2 + $0x20] sm:$0xff] }
  0x14   : > { %551 = vmatpush3.msra.mxu0 %v304_v7  ;;  %604 = vmatpush3.msra.mxu1 %v304_v7  ;;  %v311_v24 = vld [vmem:[%s831_s2 + $0x98] sm:$0xff]  ;;  %v310_v26 = vld [vmem:[%s831_s2 + $0x90] sm:$0xff]  ;;  %v309_v28 = vld [vmem:[%s831_s2 + $0x88] sm:$0xff] }
  0x15   : > { %552 = vmatprep.subr.mxu0 %v319_v8  ;;  %589 = vmatprep.subr.mxu1 %v319_v8  ;;  %v295_v25 = vld [vmem:[%s831_s2 + $0x18] sm:$0xff]  ;;  %v294_v27 = vld [vmem:[%s831_s2 + $0x10] sm:$0xff]  ;;  %v293_v29 = vld [vmem:[%s831_s2 + $0x8] sm:$0xff] }
  0x16   : > { %553 = vmatpush3.msra.mxu0 %v303_v9  ;;  %605 = vmatpush3.msra.mxu1 %v303_v9  ;;  %v308_v30 = vld [vmem:[%s831_s2 + $0x80] sm:$0xff]  ;;  %v287_v32 = vld [vmem:[%s256_s30 + $0x8] sm:$0xff]  ;;  %v289_v33 = vld [vmem:[%s256_s30 + $0x18] sm:$0xff] }
  0x17   : > { %554 = vmatprep.subr.mxu0 %v318_v10  ;;  %590 = vmatprep.subr.mxu1 %v318_v10  ;;  %v292_v31 = vld [vmem:[%s831_s2] sm:$0xff]  ;;  %v288_v35 = vld [vmem:[%s256_s30 + $0x10] sm:$0xff]  ;;  %v291_v36 = vld [vmem:[%s256_s30 + $0x28] sm:$0xff] }
  0x18   : > { %555 = vmatpush3.msra.mxu0 %v302_v11  ;;  %606 = vmatpush3.msra.mxu1 %v302_v11  ;;  %v286_v34 = vld [vmem:[%s256_s30] sm:$0xff] }
  0x19   : > { %556 = vmatprep.subr.mxu0 %v317_v12  ;;  %591 = vmatprep.subr.mxu1 %v317_v12  ;;  %v290_v37 = vld [vmem:[%s256_s30 + $0x20] sm:$0xff] }
  0x1a   : > { %557 = vmatpush3.msra.mxu0 %v301_v13  ;;  %607 = vmatpush3.msra.mxu1 %v301_v13 }
  0x1b   : > { %558 = vmatprep.subr.mxu0 %v316_v14  ;;  %592 = vmatprep.subr.mxu1 %v316_v14 }
  0x1c   : > { %559 = vmatpush3.msra.mxu0 %v300_v15  ;;  %608 = vmatpush3.msra.mxu1 %v300_v15 }
  0x1d   : > { %560 = vmatprep.subr.mxu0 %v315_v16  ;;  %593 = vmatprep.subr.mxu1 %v315_v16 }
  0x1e   : > { %561 = vmatpush3.msra.mxu0 %v299_v17  ;;  %609 = vmatpush3.msra.mxu1 %v299_v17 }
  0x1f   : > { %562 = vmatprep.subr.mxu0 %v314_v18  ;;  %594 = vmatprep.subr.mxu1 %v314_v18 }
  0x20   : > { %563 = vmatpush3.msra.mxu0 %v298_v19  ;;  %610 = vmatpush3.msra.mxu1 %v298_v19 }
  0x21   : > { %564 = vmatprep.subr.mxu0 %v313_v20  ;;  %595 = vmatprep.subr.mxu1 %v313_v20 }
  0x22   : > { %565 = vmatpush3.msra.mxu0 %v297_v21  ;;  %611 = vmatpush3.msra.mxu1 %v297_v21 }
  0x23   : > { %566 = vmatprep.subr.mxu0 %v312_v22  ;;  %596 = vmatprep.subr.mxu1 %v312_v22 }
  0x24   : > { %567 = vmatpush3.msra.mxu0 %v296_v23  ;;  %612 = vmatpush3.msra.mxu1 %v296_v23 }
  0x25   : > { %568 = vmatprep.subr.mxu0 %v311_v24  ;;  %597 = vmatprep.subr.mxu1 %v311_v24 }
  0x26   : > { %569 = vmatpush3.msra.mxu0 %v295_v25  ;;  %613 = vmatpush3.msra.mxu1 %v295_v25 }
  0x27   : > { %570 = vmatprep.subr.mxu0 %v310_v26  ;;  %598 = vmatprep.subr.mxu1 %v310_v26 }
  0x28   : > { %571 = vmatpush3.msra.mxu0 %v294_v27  ;;  %614 = vmatpush3.msra.mxu1 %v294_v27 }
  0x29   : > { %572 = vmatprep.subr.mxu0 %v309_v28  ;;  %599 = vmatprep.subr.mxu1 %v309_v28 }
  0x2a   : > { %573 = vmatpush3.msra.mxu0 %v293_v29  ;;  %615 = vmatpush3.msra.mxu1 %v293_v29 }
  0x2b   : > { %574 = vmatprep.subr.mxu0 %v308_v30  ;;  %600 = vmatprep.subr.mxu1 %v308_v30 }
  0x2c   : > { %575 = vmatpush3.msra.mxu0 %v292_v31  ;;  %616 = vmatpush3.msra.mxu1 %v292_v31 }
  0x2d   : > { %388 = vmatprep.mubr.f32.mxu0 %v287_v32  ;;  %393 = vmatprep.mubr.f32.mxu1 %v289_v33 }
  0x2e   : > { %389 = vmatmul.mubr.f32.vlgmr.msra.gmra.mxu0 %v286_v34  ;;  %394 = vmatmul.mubr.f32.vlgmr.msra.gmra.mxu1 %v288_v35 }
  0x2f   : > { %398 = vmatprep.mubr.f32.mxu1 %v291_v36 }
  0x32   : > { %399 = vmatmul.mubr.f32.gmra.mxu1 %v290_v37 }
  0xee   : > { %v576_v38 = vpop.f32.mrf.mxu0  ;;  %v579_v39 = vpop.f32.mrf.mxu1 }
  0xf0   : > { %v577_v40 = vpop.f32.mrf.mxu0  ;;  %v580_v41 = vpop.f32.mrf.mxu1 }
  0xf1   : > { %v578_v42 = vadd.f32 %v577_v40, %v576_v38  ;;  %v581_v43 = vadd.f32 %v580_v41, %v579_v39 }
  0xf2   : > { %v582_v44 = vpop.f32.mrf.mxu1 }
  0xf3   : > { %v407_v45 = vmul.f32 0.70710677, %v578_v42  ;;  %v408_v46 = vmul.f32 0.70710677, %v581_v43  ;;  %v404_v52 = vmul.f32 0.5, %v578_v42  ;;  %v405_v54 = vmul.f32 0.5, %v581_v43 }
  0xf4   : > { %v583_v47 = vpop.f32.mrf.mxu1 }
  0xf5   : > { %642 = verf.f32 %v407_v45  ;;  %v584_v48 = vadd.f32 %v583_v47, %v582_v44 }
  0xf6   : > { %644 = verf.f32 %v408_v46 }
  0xf7   : > { %v409_v49 = vmul.f32 0.70710677, %v584_v48  ;;  %v406_v59 = vmul.f32 0.5, %v584_v48 }
  0xf9   : > { %646 = verf.f32 %v409_v49 }
 0x102   : > { %v643_v50 = vpop.eup %642 }
 0x103   : > { %v645_v51 = vpop.eup %644  ;;  %v413_v53 = vadd.f32 1.0, %v643_v50 }
 0x104   : > { %v414_v55 = vadd.f32 1.0, %v645_v51 }
 0x105   : > { %v416_v56 = vmul.f32 %v413_v53, %v404_v52 }
 0x106   : > { %v647_v57 = vpop.eup %646  ;;  %v417_v58 = vmul.f32 %v414_v55, %v405_v54 }
 0x107   : > { %419 = vst [vmem:[%s284_s11] sm:$0xff] %v416_v56  ;;  %v415_v60 = vadd.f32 1.0, %v647_v57 }
 0x108   : > { %420 = vst [vmem:[%s284_s11 + $0x8] sm:$0xff] %v417_v58 }
 0x109   : > { %v418_v61 = vmul.f32 %v415_v60, %v406_v59 }
 0x10b   : > { %421 = vst [vmem:[%s284_s11 + $0x10] sm:$0xff] %v418_v61 }
 0x10c PF: > { %s13_s14 = sadd.s32 1, %s670_s14   ;;  %s833_s12 = smov %s666_s13 }
 0x10d   : > { %p10_p5 = scmp.ge.s32.totalorder %s13_s14, 4   ;;  %s834_s13 = smov %s836_s1 }
 0x10f   :  { %12 = sbr.rel (!%p10_p5) target bundleno = 2 (0x2), region = 65 }

</bundles_post_ra>
